<compile_context>
chip_gen: v7x
topology: tpu7x:2x2x1
jax: 0.10.0
libtpu: 0.0.40
codegen_flags: <defaults>
</compile_context>

<pallas_src>
import functools

import jax
import jax.numpy as jnp
from jax.experimental import pallas as pl
from jax.experimental.pallas import tpu as pltpu


def _round_up(x, m):
    return ((x + m - 1) // m) * m


def _vmem_capacity_bytes():
    """Per-TensorCore VMEM capacity; conservative (v7x) fallback if the query fails."""
    try:
        cap = getattr(pltpu.get_tpu_info(), "vmem_capacity_bytes", None)
        if cap:
            return int(cap)
    except Exception:
        pass
    return 64 * 1024 * 1024


def _mlp_kernel(x_ref, w1_ref, b1_ref, w2_ref, b2_ref, o_ref, h_ref, *, activation):
    # Grid = (vocab tile j [outer], batch tile i [inner]).
    # W2/b2 indices depend only on j -> fetched once per vocab tile (W2 streamed once total).
    # fc1 + bias + activation run once per batch tile (on j == 0); bf16 hidden activations
    # for every batch tile stay resident in the VMEM scratch h_ref.
    j = pl.program_id(0)   # vocab tile (sequential; carries the hidden-scratch dependency)
    i = pl.program_id(1)   # batch tile

    @pl.when(j == 0)
    def _():
        h = jnp.dot(x_ref[...], w1_ref[...], preferred_element_type=jnp.float32)
        h = h + b1_ref[...]                      # fp32 epilogue
        if activation == "ReLU":
            h = jnp.maximum(h, 0.0)
        else:  # "Tanh"
            h = jnp.tanh(h)
        h_ref[i] = h.astype(h_ref.dtype)         # bf16 -> MXU-native second dot

    out = jnp.dot(h_ref[i], w2_ref[...], preferred_element_type=jnp.float32)
    o_ref[...] = (out + b2_ref[...]).astype(o_ref.dtype)


def _mlp_pallas(x_chunk, w1_bf, b1_row, w2_bf, b2_row, *, activation, TB, TN,
                vmem_ceiling, out_dtype):
    Bc, K = x_chunk.shape
    H = w1_bf.shape[1]
    V_pad = w2_bf.shape[1]
    B_pad = _round_up(Bc, TB)
    nb = B_pad // TB
    nv = V_pad // TN
    if B_pad != Bc:
        x_chunk = jnp.pad(x_chunk, ((0, B_pad - Bc), (0, 0)))

    bpe = 2  # bf16 bytes/elem
    est_vmem = (2 * (TB * K * bpe + H * TN * bpe + TN * 4 + TB * TN * 4)   # streamed (dbl buf)
                + 2 * (K * H * bpe + H * 4)                                # resident W1/b1
                + nb * TB * H * bpe)                                       # hidden scratch
    vmem_limit = int(min(max(32 * 1024 * 1024, 2 * est_vmem), vmem_ceiling))

    cost = pl.CostEstimate(
        flops=2 * B_pad * K * H + 2 * B_pad * H * V_pad,
        transcendentals=B_pad * H if activation == "Tanh" else 0,
        bytes_accessed=(nv * B_pad * K * bpe              # x re-streamed per vocab tile
                        + K * H * bpe + H * 4             # W1 / b1 fetched once
                        + H * V_pad * bpe + V_pad * 4     # W2 / b2 fetched once
                        + B_pad * V_pad * 4),             # output writeback
    )

    kernel = functools.partial(_mlp_kernel, activation=activation)

    out = pl.pallas_call(
        kernel,
        out_shape=jax.ShapeDtypeStruct((B_pad, V_pad), out_dtype),
        grid=(nv, nb),  # vocab outer, batch inner -> W2 streamed from HBM once total
        in_specs=[
            pl.BlockSpec((TB, K), lambda j, i: (i, 0)),    # x: per batch tile
            pl.BlockSpec((K, H), lambda j, i: (0, 0)),     # W1: fully resident
            pl.BlockSpec((1, H), lambda j, i: (0, 0)),     # b1: resident
            pl.BlockSpec((H, TN), lambda j, i: (0, j)),    # W2: one fetch per vocab tile
            pl.BlockSpec((1, TN), lambda j, i: (0, j)),    # b2: one fetch per vocab tile
        ],
        out_specs=pl.BlockSpec((TB, TN), lambda j, i: (i, j)),   # lane-dense stores
        scratch_shapes=[pltpu.VMEM((nb, TB, H), jnp.bfloat16)],  # hidden acts, all batch tiles
        compiler_params=pltpu.CompilerParams(
            # Outer (vocab) axis carries the hidden-scratch dependency -> "arbitrary".
            # Inner batch axis kept "arbitrary" too (parallel dims must lead the grid for
            # megacore sharding; measured impact of parallel-vs-arbitrary is ~0 anyway).
            dimension_semantics=("arbitrary", "arbitrary"),
            vmem_limit_bytes=vmem_limit,
        ),
        cost_estimate=cost,
    )(x_chunk, w1_bf, b1_row, w2_bf, b2_row)
    return out[:Bc]


def next_word_predictor_forward(tokens, params, *, block_size, activation="ReLU",
                                tn=None, tb_max=256, out_dtype=jnp.float32):
    """Forward pass matching the PyTorch NextWordPredictor.

    tokens: int32 (B, block_size) token indices
    params: dict with 'emb' (V, E), 'w1' (E*T, H), 'b1' (H,), 'w2' (H, V), 'b2' (V,)
            (w1/w2 stored transposed vs. torch nn.Linear weights)
    """
    if activation not in ("ReLU", "Tanh"):
        raise ValueError("Unsupported activation function. Choose 'ReLU' or 'Tanh'.")
    if tokens.shape[1] != block_size:
        raise RuntimeError(
            "Input size mismatch: ensure block_size matches during prediction.")

    B = tokens.shape[0]
    emb = params["emb"]
    w1, b1 = params["w1"], params["b1"]
    w2, b2 = params["w2"], params["b2"]

    E = emb.shape[1]
    K = block_size * E
    H = w1.shape[1]
    V = w2.shape[1]

    # Embedding lookup (gather) + flatten (B, T, E) -> (B, T*E); streamed as bf16.
    # NOTE: jnp.take clamps out-of-range ids (torch.nn.Embedding would raise).
    x_flat = jnp.take(emb, tokens, axis=0).reshape(B, K).astype(jnp.bfloat16)

    vmem_cap = _vmem_capacity_bytes()
    vmem_ceiling = (3 * vmem_cap) // 4          # ~48 MiB (v7x), ~96 MiB (v5e/v6e)

    # --- generation-aware, hardened tile sizes ---
    if tn is None:
        tn = 4096 if vmem_cap >= 100 * 1024 * 1024 else 2048
    TN = min(_round_up(max(tn, 128), 128), _round_up(V, 128))    # force lane-dense tiles
    TB = min(_round_up(B, 8), _round_up(max(tb_max, 8), 8))      # force sublane alignment
    V_pad = _round_up(V, TN)

    w1_bf = w1.astype(jnp.bfloat16)
    w2_bf = w2.astype(jnp.bfloat16)
    b2_full = b2
    if V_pad != V:
        w2_bf = jnp.pad(w2_bf, ((0, 0), (0, V_pad - V)))
        b2_full = jnp.pad(b2, (0, V_pad - V))
    b1_row = b1.reshape(1, H).astype(jnp.float32)
    b2_row = b2_full.reshape(1, V_pad).astype(jnp.float32)

    # Keep the resident hidden scratch under ~1/3 of the scoped-VMEM budget; chunk huge
    # batches (each extra chunk re-streams W2 exactly once - the unavoidable minimum).
    rows_budget = max(TB, (vmem_ceiling // 3) // (H * 2))
    rows_per_chunk = max(TB, (rows_budget // TB) * TB)

    outs = []
    for start in range(0, B, rows_per_chunk):
        xb = x_flat[start:start + rows_per_chunk]
        outs.append(_mlp_pallas(xb, w1_bf, b1_row, w2_bf, b2_row,
                                activation=activation, TB=TB, TN=TN,
                                vmem_ceiling=vmem_ceiling, out_dtype=out_dtype))
    out = outs[0] if len(outs) == 1 else jnp.concatenate(outs, axis=0)
    return out[:, :V]


def _reference_forward(tokens, params, *, block_size, activation):
    """Pure-JAX reference following the same bf16-weights / fp32-accumulate path."""
    emb, w1, b1, w2, b2 = (params["emb"], params["w1"], params["b1"],
                           params["w2"], params["b2"])
    B = tokens.shape[0]
    x = jnp.take(emb, tokens, axis=0).reshape(B, -1).astype(jnp.bfloat16)
    h = jnp.dot(x, w1.astype(jnp.bfloat16),
                preferred_element_type=jnp.float32) + b1
    h = jnp.maximum(h, 0.0) if activation == "ReLU" else jnp.tanh(h)
    out = jnp.dot(h.astype(jnp.bfloat16), w2.astype(jnp.bfloat16),
                  preferred_element_type=jnp.float32) + b2
    return out


def init_params(key, vocab_size, embedding_dim, hidden_dim, block_size):
    """Deterministic synthetic init (shapes match the torch module's __init__)."""
    k_emb, k_w1, k_b1, k_w2, k_b2 = jax.random.split(key, 5)
    in1 = embedding_dim * block_size
    params = {
        # nn.Embedding(vocab_size, embedding_dim)
        "emb": jax.random.normal(k_emb, (vocab_size, embedding_dim), jnp.float32),
        # nn.Linear(embedding_dim*block_size, hidden_dim): torch W is (H, in); stored transposed.
        "w1": jax.random.normal(k_w1, (in1, hidden_dim), jnp.float32) * (1.0 / jnp.sqrt(in1)),
        "b1": jax.random.normal(k_b1, (hidden_dim,), jnp.float32) * 0.01,
        # nn.Linear(hidden_dim, vocab_size): torch W is (V, H); stored transposed.
        "w2": jax.random.normal(k_w2, (hidden_dim, vocab_size), jnp.float32) * (1.0 / jnp.sqrt(hidden_dim)),
        "b2": jax.random.normal(k_b2, (vocab_size,), jnp.float32) * 0.01,
    }
    return params


if __name__ == "__main__":
    # Small, module-consistent shapes.
    vocab_size = 256        # len(vocab) -- synthetic
    embedding_dim = 64      # selectbox option
    block_size = 6          # selectbox option
    hidden_dim = 1024       # fixed in the module

    key = jax.random.PRNGKey(0)
    k_params, k_tok1, k_tok2 = jax.random.split(key, 3)
    params = init_params(k_params, vocab_size, embedding_dim, hidden_dim, block_size)

    # Case 1: toy batch; tn=128 -> two streamed vocab tiles (outer axis), one batch tile.
    tokens1 = jax.random.randint(k_tok1, (2, block_size), 0, vocab_size, dtype=jnp.int32)
    out1 = jax.block_until_ready(next_word_predictor_forward(
        tokens1, params, block_size=block_size, activation="ReLU", tn=128))
    ref1 = jax.block_until_ready(_reference_forward(
        tokens1, params, block_size=block_size, activation="ReLU"))
    assert out1.shape == (2, vocab_size)
    assert out1.dtype == jnp.float32
    assert bool(jnp.all(jnp.isfinite(out1)))
    assert bool(jnp.allclose(out1, ref1, atol=5e-2, rtol=5e-2))

    # Case 2: multiple batch tiles (inner axis) x multiple vocab tiles (outer axis), Tanh.
    tokens2 = jax.random.randint(k_tok2, (20, block_size), 0, vocab_size, dtype=jnp.int32)
    out2 = jax.block_until_ready(next_word_predictor_forward(
        tokens2, params, block_size=block_size, activation="Tanh", tn=128, tb_max=8))
    ref2 = jax.block_until_ready(_reference_forward(
        tokens2, params, block_size=block_size, activation="Tanh"))
    assert out2.shape == (20, vocab_size)
    assert bool(jnp.all(jnp.isfinite(out2)))
    assert bool(jnp.allclose(out2, ref2, atol=5e-2, rtol=5e-2))

    print("KERNEL_OK")
</pallas_src>

<mosaic_0001>
module attributes {stable_mosaic.version = 11 : i64} {
  func.func @_mlp_kernel(%arg0: i32, %arg1: i32, %arg2: memref<8x384xbf16, #tpu.memory_space<vmem>>, %arg3: memref<384x1024xbf16, #tpu.memory_space<vmem>>, %arg4: memref<1x1024xf32, #tpu.memory_space<vmem>>, %arg5: memref<1024x128xbf16, #tpu.memory_space<vmem>>, %arg6: memref<1x128xf32, #tpu.memory_space<vmem>>, %arg7: memref<8x128xf32, #tpu.memory_space<vmem>>, %arg8: memref<1x8x1024xbf16, #tpu.memory_space<vmem>>) attributes {dimension_semantics = [#tpu.dimension_semantics<arbitrary>, #tpu.dimension_semantics<arbitrary>], iteration_bounds = array<i64: 2, 1>, scalar_prefetch = 0 : i64, scratch_operands = 1 : i64, tpu.core_type = #tpu.core_type<tc>, window_params = [{transform_indices = @transform_0, window_bounds = array<i64: 8, 384>}, {pipeline_mode = #tpu.pipeline_mode<synchronous>, transform_indices = @transform_1, window_bounds = array<i64: 384, 1024>}, {pipeline_mode = #tpu.pipeline_mode<synchronous>, transform_indices = @transform_2, window_bounds = array<i64: 1, 1024>}, {transform_indices = @transform_3, window_bounds = array<i64: 1024, 128>}, {transform_indices = @transform_4, window_bounds = array<i64: 1, 128>}, {transform_indices = @transform_5, window_bounds = array<i64: 8, 128>}]} {
    %c0_i32 = arith.constant 0 : i32
    %0 = arith.cmpi eq, %arg0, %c0_i32 : i32
    %1 = arith.extui %0 : i1 to i32
    %c0_i32_0 = arith.constant 0 : i32
    %2 = arith.cmpi ne, %1, %c0_i32_0 : i32
    scf.if %2 {
      %c0_8 = arith.constant 0 : index
      %c0_9 = arith.constant 0 : index
      %12 = vector.load %arg2[%c0_8, %c0_9] : memref<8x384xbf16, #tpu.memory_space<vmem>>, vector<8x384xbf16>
      %c0_10 = arith.constant 0 : index
      %c0_11 = arith.constant 0 : index
      %13 = vector.load %arg3[%c0_10, %c0_11] : memref<384x1024xbf16, #tpu.memory_space<vmem>>, vector<384x1024xbf16>
      %cst_12 = arith.constant dense<0.000000e+00> : vector<8x1024xf32>
      %14 = tpu.matmul %12, %13, %cst_12 {dimension_numbers = #tpu.dot_dimension_numbers<[1], [0], [0], [1], [0, 0, 1, 1], [], []>} : vector<8x384xbf16>, vector<384x1024xbf16>, vector<8x1024xf32> -> vector<8x1024xf32>
      %c0_13 = arith.constant 0 : index
      %c0_14 = arith.constant 0 : index
      %15 = vector.load %arg4[%c0_13, %c0_14] : memref<1x1024xf32, #tpu.memory_space<vmem>>, vector<1x1024xf32>
      %16 = vector.broadcast %15 : vector<1x1024xf32> to vector<8x1024xf32>
      %17 = arith.addf %14, %16 : vector<8x1024xf32>
      %cst_15 = arith.constant 0.000000e+00 : f32
      %18 = vector.broadcast %cst_15 : f32 to vector<8x1024xf32>
      %19 = arith.maximumf %17, %18 : vector<8x1024xf32>
      %20 = arith.truncf %19 : vector<8x1024xf32> to vector<8x1024xbf16>
      %21 = arith.index_cast %arg1 : i32 to index
      %c0_16 = arith.constant 0 : index
      %c0_17 = arith.constant 0 : index
      %22 = vector.load %arg8[%21, %c0_16, %c0_17] : memref<1x8x1024xbf16, #tpu.memory_space<vmem>>, vector<1x8x1024xbf16>
      %23 = vector.shape_cast %22 : vector<1x8x1024xbf16> to vector<8x1024xbf16>
      %24 = vector.shape_cast %20 : vector<8x1024xbf16> to vector<1x8x1024xbf16>
      tpu.vector_store %arg8[%21, %c0_16, %c0_17], %24 {strides = array<i32>} : memref<1x8x1024xbf16, #tpu.memory_space<vmem>>, vector<1x8x1024xbf16>,
    } else {
    }
    %3 = arith.index_cast %arg1 : i32 to index
    %c0 = arith.constant 0 : index
    %c0_1 = arith.constant 0 : index
    %4 = vector.load %arg8[%3, %c0, %c0_1] : memref<1x8x1024xbf16, #tpu.memory_space<vmem>>, vector<1x8x1024xbf16>
    %5 = vector.shape_cast %4 : vector<1x8x1024xbf16> to vector<8x1024xbf16>
    %c0_2 = arith.constant 0 : index
    %c0_3 = arith.constant 0 : index
    %6 = vector.load %arg5[%c0_2, %c0_3] : memref<1024x128xbf16, #tpu.memory_space<vmem>>, vector<1024x128xbf16>
    %cst = arith.constant dense<0.000000e+00> : vector<8x128xf32>
    %7 = tpu.matmul %5, %6, %cst {dimension_numbers = #tpu.dot_dimension_numbers<[1], [0], [0], [1], [0, 0, 1, 1], [], []>} : vector<8x1024xbf16>, vector<1024x128xbf16>, vector<8x128xf32> -> vector<8x128xf32>
    %c0_4 = arith.constant 0 : index
    %c0_5 = arith.constant 0 : index
    %8 = vector.load %arg6[%c0_4, %c0_5] : memref<1x128xf32, #tpu.memory_space<vmem>>, vector<1x128xf32>
    %9 = vector.broadcast %8 : vector<1x128xf32> to vector<8x128xf32>
    %10 = arith.addf %7, %9 : vector<8x128xf32>
    %c0_6 = arith.constant 0 : index
    %c0_7 = arith.constant 0 : index
    %11 = vector.load %arg7[%c0_6, %c0_7] : memref<8x128xf32, #tpu.memory_space<vmem>>, vector<8x128xf32>
    tpu.vector_store %arg7[%c0_6, %c0_7], %10 {strides = array<i32>} : memref<8x128xf32, #tpu.memory_space<vmem>>, vector<8x128xf32>,
    return
  }
  func.func @transform_0(%arg0: i32, %arg1: i32) -> (i32, i32) {
    %c0_i32 = arith.constant 0 : i32
    %c0_i32_0 = arith.constant 0 : i32
    return %arg1, %c0_i32 : i32, i32
  }
  func.func @transform_1(%arg0: i32, %arg1: i32) -> (i32, i32) {
    %c0_i32 = arith.constant 0 : i32
    %c0_i32_0 = arith.constant 0 : i32
    %c0_i32_1 = arith.constant 0 : i32
    return %c0_i32, %c0_i32_0 : i32, i32
  }
  func.func @transform_2(%arg0: i32, %arg1: i32) -> (i32, i32) {
    %c0_i32 = arith.constant 0 : i32
    %c0_i32_0 = arith.constant 0 : i32
    %c0_i32_1 = arith.constant 0 : i32
    return %c0_i32, %c0_i32_0 : i32, i32
  }
  func.func @transform_3(%arg0: i32, %arg1: i32) -> (i32, i32) {
    %c0_i32 = arith.constant 0 : i32
    %c0_i32_0 = arith.constant 0 : i32
    return %c0_i32, %arg0 : i32, i32
  }
  func.func @transform_4(%arg0: i32, %arg1: i32) -> (i32, i32) {
    %c0_i32 = arith.constant 0 : i32
    %c0_i32_0 = arith.constant 0 : i32
    return %c0_i32, %arg0 : i32, i32
  }
  func.func @transform_5(%arg0: i32, %arg1: i32) -> (i32, i32) {
    %c0_i32 = arith.constant 0 : i32
    return %arg1, %arg0 : i32, i32
  }
}

</mosaic_0001>

<bundles_post_ra>
// kernel: tpu_custom_call.1
= control target key start
LH: loop header
LB: loop body
LE: loop exit
PB: predicated region body
PF: predicated region fallthrough
CT: control target
= control target key end

     0   :  { %10 = vsyncpa [#allocation4], 0  ;;  %s3963_s0 = inlined_call_operand.hbm [shape: bf16[8,384], index: 0, kind: input, shape index: {}]   ;;  %s3964_s1 = inlined_call_operand.hbm [shape: bf16[384,1024], index: 1, kind: input, shape index: {}]   ;;  %s3965_s2 = inlined_call_operand.hbm [shape: f32[1,1024], index: 2, kind: input, shape index: {}]   ;;  %s3966_s3 = inlined_call_operand.hbm [shape: bf16[1024,256], index: 3, kind: input, shape index: {}]   ;;  %s3967_s4 = inlined_call_operand.vmem [shape: f32[1,256], index: 4, kind: input, shape index: {}]   ;;  %s3968_s5 = inlined_call_operand.hbm [shape: f32[8,256], index: 5, kind: output, shape index: {}]  }
   0x1   :  { %11 = vsyncpa [#allocation7], 0 }
   0x2   :  { %12 = vsyncpa [#allocation10], 0 }
   0x3   :  { %14 = vsyncpa [#allocation10 + $0x1], 0 }
   0x4   :  { %15 = vsyncpa [#allocation5], 0 }
   0x5   :  { %17 = vsyncpa [#allocation5 + $0x1], 0  ;;  %s3591_s18 = smov 0   ;;  %s3593_s19 = smov 0  }
   0x6   :  { %s3595_s20 = smov 0   ;;  %s3597_s21 = smov 0  }
   0x7   :  { %s3599_s22 = smov 0   ;;  %s3601_s23 = smov 0  }
   0x8 LB: > { %3979 = sst [smem:[#allocation16_spill]] %s3528_s18  ;;  %s2762_s24 = sadd.s32 4294967295, %s3548_s23   ;;  %s3548_s23 = sphi %s3601_s23, %s23_s23   ;;  %s3544_s22 = sphi %s3599_s22, %s4005_s22   ;;  %s3540_s21 = sphi %s3597_s21, %s4004_s21   ;;  %s3536_s20 = sphi %s3595_s20, %s4003_s20   ;;  %s3532_s19 = sphi %s3593_s19, %s4002_s19   ;;  %s3528_s18 = sphi %s3591_s18, %s4001_s18  }
   0x9   : > { %3980 = sst [smem:[#allocation17_spill]] %s3548_s23  ;;  %s2763_s25 = sadd.s32 4294967294, %s3548_s23  }
   0xa   : > { %p117_p0 = scmp.ne.s32.totalorder %s3536_s20, %s3532_s19  ;;  %p118_p1 = scmp.eq.s32.totalorder %s3548_s23, 0 }
   0xb   : > { %p123_p2 = scmp.ne.s32.totalorder %s3532_s19, %s3528_s18  ;;  %p3628_p3 = scmp.eq.s32.totalorder %s2762_s24, 0 }
   0xc   : > { %p3632_p4 = por %p118_p1, %p117_p0  ;;  %p175_p5 = scmp.eq.s32.totalorder %s2762_s24, 1 }
   0xd   : > { %s3981_s26 = scalar_select %p3628_p3, 1, 0 }
   0xe   : > { %p3638_p6 = por %p3628_p3, %p123_p2  ;;  %p181_p7 = scmp.eq.s32.totalorder %s2763_s25, 1 }
   0xf   : > { %p3642_p8 = por %p175_p5, %p117_p0  ;;  %p2764_p9 = scmp.ge.s32.totalorder %s3548_s23, 1 }
  0x10   : > { %s3983_s28 = scalar_select %p3638_p6, 1, 0 }
  0x11   : > { %s3984_s29 = scalar_select %p3642_p8, 1, 0 }
  0x12   : > { %p3647_p10 = por %p181_p7, %p123_p2  ;;  %p188_p11 = scmp.lt.s32.totalorder %s3548_s23, 3 }
  0x13   : > { %s3550_s7 = smov [#allocation6]   ;;  %p3207_p1 = scmp.lt.s32.totalorder %s3548_s23, 2 }
  0x14   : > { %s3985_s30 = scalar_select %p3647_p10, 1, 0 }
  0x15   : > { %p3652_p12 = pnand %p2764_p9, %p188_p11  ;;  %s214_s8 = sshll.u32 %s3550_s7, 4  ;;  %s215_s8 = int_to_ptr.vmem [resolvable:$true] %s214_s8 }
  0x16   : > { %3986 = sst [smem:[#allocation18_spill]] %s3985_s30  ;;  %p3668_p2 = pnand %p3207_p1, %p3632_p4 }
  0x17   : > { %s3987_s6 = scalar_select %p3652_p12, 1, 0 }
  0x18   : > { %p3186_p13 = pneg %p3652_p12  ;;  %s3344_s13 = scalar_lea.hbm %s3964_s1, 24576 }
  0x19   : > { %s3989_s10 = scalar_select %p3668_p2, 1, 0 }
  0x1a   : > { %p3662_p5 = pnand %p3186_p13, %p3628_p3  ;;  %p3345_p7 = scmp.ne.s32.totalorder %s3964_s1, %s3344_s13 }
  0x1b   : > { %p3351_p13 = scmp.lt.u32.totalorder %s3344_s13, %s3964_s1 }
  0x1c   : > { %p3680_p9 = pneg %p3662_p5 }
  0x1e   : > { %p3347_p11 = pnand %p3680_p9, %p3345_p7 }
  0x20   : > { %p3348_p4 = pneg %p3347_p11 }
  0x22   : > { %p3353_p1 = pnand %p3351_p13, %p3348_p4 }
  0x24   : > { %3356 = shalt.err (!%p3353_p1)
}
  0x25   : > { %s3357_s25 = scalar_lea.vmem %s215_s8, 24576  ;;  %p3365_p6 = scmp.lt.s32.totalorder %s215_s8, %s215_s8 }
  0x26   : > { %p3358_p0 = scmp.ne.s32.totalorder %s215_s8, %s3357_s25  ;;  %p3366_p3 = scmp.lt.s32.totalorder %s3357_s25, %s3357_s25 }
  0x28   : > { %p3360_p10 = pnand %p3358_p0, %p3680_p9  ;;  %p3367_p12 = por %p3366_p3, %p3365_p6 }
  0x2a   : > { %p3361_p8 = pneg %p3360_p10 }
  0x2c   : > { %p3368_p2 = pnand %p3367_p12, %p3361_p8 }
  0x2e   : > { %3371 = shalt.err (!%p3368_p2)
}
  0x2f   : > { %s3551_s27 = smov 512   ;;  %s3552_s7 = smov 32  }
  0x30   : > { %3192 = dma.hbm_to_vmem [thread:$0]  (!%p3662_p5), %s3964_s1, 24576, %s215_s8, [#allocation7], %s3551_s27, %s3551_s27, %s3552_s7  }
  0x31   : > { %s3553_s13 = smov [#allocation3]   ;;  %s3372_s24 = scalar_lea.hbm %s3963_s0, 192 }
  0x32   : > { %s204_s14 = sshll.u32 %s3553_s13, 4  ;;  %p3373_p3 = scmp.ne.s32.totalorder %s3963_s0, %s3372_s24  ;;  %s205_s14 = int_to_ptr.vmem [resolvable:$true] %s204_s14 }
  0x33   : > { %p3379_p10 = scmp.lt.u32.totalorder %s3372_s24, %s3963_s0 }
  0x34   : > { %p3375_p6 = pnand %p3373_p3, %p3680_p9 }
  0x36   : > { %p3376_p8 = pneg %p3375_p6 }
  0x38   : > { %p3381_p12 = pnand %p3379_p10, %p3376_p8 }
  0x3a   : > { %3384 = shalt.err (!%p3381_p12)
}
  0x3b   : > { %s3385_s8 = scalar_lea.vmem %s205_s14, 192  ;;  %p3393_p11 = scmp.lt.s32.totalorder %s205_s14, %s205_s14 }
  0x3c   : > { %p3386_p0 = scmp.ne.s32.totalorder %s205_s14, %s3385_s8  ;;  %p3394_p4 = scmp.lt.s32.totalorder %s3385_s8, %s3385_s8 }
  0x3e   : > { %p3388_p2 = pnand %p3386_p0, %p3680_p9  ;;  %p3395_p13 = por %p3394_p4, %p3393_p11 }
  0x40   : > { %p3389_p7 = pneg %p3388_p2 }
  0x42   : > { %p3396_p1 = pnand %p3395_p13, %p3389_p7 }
  0x44   : > { %3399 = shalt.err (!%p3396_p1)
}
  0x45   : > { %3189 = dma.hbm_to_vmem [thread:$0]  (!%p3662_p5), %s3963_s0, 192, %s205_s14, [#allocation4]  }
  0x46   : > { %s3554_s18 = smov [#allocation8]   ;;  %s3400_s12 = scalar_lea.hbm %s3965_s2, 128 }
  0x47   : > { %s228_s30 = sshll.u32 %s3554_s18, 4  ;;  %p3401_p3 = scmp.ne.s32.totalorder %s3965_s2, %s3400_s12  ;;  %s229_s30 = int_to_ptr.vmem [resolvable:$true] %s228_s30 }
  0x48   : > { %p3407_p10 = scmp.lt.u32.totalorder %s3400_s12, %s3965_s2 }
  0x49   : > { %p3403_p6 = pnand %p3401_p3, %p3680_p9 }
  0x4b   : > { %p3404_p8 = pneg %p3403_p6 }
  0x4d   : > { %p3409_p12 = pnand %p3407_p10, %p3404_p8 }
  0x4f   : > { %3412 = shalt.err (!%p3409_p12)
}
  0x50   : > { %s3413_s14 = scalar_lea.vmem %s229_s30, 128  ;;  %p3421_p11 = scmp.lt.s32.totalorder %s229_s30, %s229_s30 }
  0x51   : > { %p3414_p0 = scmp.ne.s32.totalorder %s229_s30, %s3413_s14  ;;  %p3422_p4 = scmp.lt.s32.totalorder %s3413_s14, %s3413_s14 }
  0x53   : > { %p3416_p2 = pnand %p3414_p0, %p3680_p9  ;;  %p3423_p13 = por %p3422_p4, %p3421_p11 }
  0x55   : > { %p3417_p7 = pneg %p3416_p2 }
  0x57   : > { %p3424_p1 = pnand %p3423_p13, %p3417_p7 }
  0x59   : > { %3427 = shalt.err (!%p3424_p1)
}
  0x5a   : > { %3195 = dma.hbm_to_vmem [thread:$0]  (!%p3662_p5), %s3965_s2, 128, %s229_s30, [#allocation7]  }
  0x5b   : > { %s35_s16 = sadd.s32 1, %s3544_s22  ;;  %s110_s23 = sadd.s32 1, %s3536_s20 }
  0x5c   : > { %p37_p9 = scmp.ge.s32.totalorder %s35_s16, 2  ;;  %s239_s27 = sand.u32 1, %s3536_s20  }
  0x5d   : > { %s2769_s18 = sshll.u32 %s239_s27, 9  ;;  %s2770_s9 = sshll.u32 %s3544_s22, 6 }
  0x5e   : > { %s4007_s16 = smov (%p37_p9, %s35_s16), 0  ;;  %s3743_s13 = scalar_lea.hbm %s3966_s3, %s2770_s9 }
  0x5f   : > { %s107_s7 = ssub.s32 %s3544_s22, %s4007_s16  ;;  %s243_s30 = scalar_lea.vmem [#allocation9], %s2769_s18 }
  0x60   : > { %p108_p5 = scmp.eq.s32.totalorder %s107_s7, 0  ;;  %s249_s15 = sshll.u32 %s243_s30, 4  ;;  %s3745_s15 = int_to_ptr.vmem [resolvable:$true] %s249_s15 }
  0x61   : > { %s3750_s24 = scalar_lea.sflag [#allocation10], %s239_s27  ;;  %s3428_s14 = scalar_lea.hbm %s3743_s13, 8192 }
  0x62   : > { %s3748_s17 = scalar_select %p108_p5, %s3536_s20, %s110_s23  }
  0x63   : > { %p3429_p3 = scmp.ne.s32.totalorder %s3743_s13, %s3428_s14  ;;  %p3991_p6 = scmp.ne.s32.totalorder %s3989_s10, 0 }
  0x64   : > { %s3433_s9 = scalar_lea.hbm %s3966_s3, 16384  ;;  %p3434_p0 = scmp.lt.u32.totalorder %s3743_s13, %s3966_s3 }
  0x65   : > { %p3430_p8 = pneg %p3991_p6  ;;  %p3435_p2 = scmp.lt.u32.totalorder %s3433_s9, %s3428_s14 }
  0x66   : > { %p3437_p11 = scmp.lt.u32.totalorder %s3428_s14, %s3743_s13 }
  0x67   : > { %p3431_p10 = pnand %p3430_p8, %p3429_p3  ;;  %p3436_p7 = por %p3435_p2, %p3434_p0 }
  0x69   : > { %p3432_p12 = pneg %p3431_p10  ;;  %p3438_p4 = por %p3437_p11, %p3436_p7 }
  0x6b   : > { %p3439_p13 = pnand %p3438_p4, %p3432_p12 }
  0x6d   : > { %3442 = shalt.err (!%p3439_p13)
}
  0x6e   : > { %s3443_s23 = scalar_lea.vmem %s3745_s15, 8192  ;;  %s3555_s27 = smov [#allocation9]  }
  0x6f   : > { %p3444_p1 = scmp.ne.s32.totalorder %s3745_s15, %s3443_s23  ;;  %s3448_s11 = sshll.u32 %s3555_s27, 4  ;;  %s3449_s11 = int_to_ptr.vmem [resolvable:$false] %s3448_s11 }
  0x70   : > { %s3450_s12 = scalar_lea.vmem %s3449_s11, 16384  ;;  %p3451_p3 = scmp.lt.s32.totalorder %s3745_s15, %s3449_s11 }
  0x71   : > { %p3446_p9 = pnand %p3444_p1, %p3430_p8  ;;  %p3452_p10 = scmp.lt.s32.totalorder %s3450_s12, %s3443_s23 }
  0x73   : > { %p3447_p5 = pneg %p3446_p9  ;;  %p3453_p0 = por %p3452_p10, %p3451_p3 }
  0x75   : > { %p3454_p2 = pnand %p3453_p0, %p3447_p5 }
  0x77   : > { %3457 = shalt.err (!%p3454_p2)
}
  0x78   : > { %s3556_s30 = smov 128   ;;  %s3557_s14 = smov 64  }
  0x79   : > { %s3558_s25 = smov 4   ;;  %p3992_p8 = scmp.ne.s32.totalorder %s3987_s6, 0 }
  0x7a   : > { %3199 = dma.hbm_to_vmem [thread:$0]  (!%p3991_p6), %s3743_s13, 8192, %s3745_s15, %s3750_s24, %s3556_s30, %s3557_s14, %s3558_s25  }
  0x7b   : > { %267 = sbr.rel (%p3992_p8) target bundleno = 855 (0x357), region = 40  ;;  %p3993_p12 = scmp.ne.s32.totalorder (!%p3992_p8), %s3981_s26, 0 }
  0x82   : > { %3511 = dma.done.wait (%p3993_p12), [#allocation4], 192  }
  0x83   : > { %3513 = vsyncadd (%p3993_p12), [#allocation4], 4294967104 }
  0x84   : > { %3515 = dma.done.wait (%p3993_p12), [#allocation7], 24704  }
  0x85   : > { %3517 = vsyncadd (%p3993_p12), [#allocation7], 4294942592  ;;  %s3789_s8 = sand.u32 1, %s3532_s19   ;;  %p3994_p6 = scmp.ne.s32.totalorder %s3983_s28, 0 }
  0x86   : > { %s2775_s6 = sshll.u32 %s3789_s8, 9  ;;  %s282_s10 = scalar_lea.sflag [#allocation10], %s3789_s8 }
  0x87   : > { %s3793_s13 = scalar_lea.vmem [#allocation9], %s2775_s6 }
  0x88   : > { %3519 = dma.done.wait (%p3994_p6), %s282_s10, 8192  }
  0x89   : > { %3521 = vsyncadd (%p3994_p6), %s282_s10, 4294959104  ;;  %s2776_s26 = sshll.u32 %s3789_s8, 3  ;;  %p315_p7 = scmp.lt.s32.totalorder %s3540_s21, 1 }
  0x8a   : > { %s3808_s7 = scalar_lea.vmem [#allocation11], %s2776_s26  ;;  %p2777_p11 = scmp.ne.s32.totalorder %s3540_s21, 0 }
  0x8b   : > { %s3802_s15 = scalar_select %p315_p7, %s3540_s21, 1 }
  0x8c   : > { %322 = sbr.rel (%p2777_p11) target bundleno = 556 (0x22c), region = 60  ;;  %v325_v0 = vld [vmem:[#allocation6] sm:$0xff] (!%p2777_p11)  ;;  %v326_v2 = vld [vmem:[#allocation6 + $0x8] sm:$0xff] (!%p2777_p11)  ;;  %v3811_v53 = vld [vmem:[#allocation3] sm:$0xff] (!%p2777_p11) }
  0x8d   : > { %s317_s18 = scalar_lea.vmem %s3967_s4, %s3802_s15  ;;  %v329_v1 = vld [vmem:[#allocation6 + $0x20] sm:$0xff] (!%p2777_p11)  ;;  %v330_v4 = vld [vmem:[#allocation6 + $0x28] sm:$0xff] (!%p2777_p11)  ;;  %v3815_v57 = vcombine.high (!%p2777_p11), %v3811_v53, %v3811_v53 }
  0x8e   : > { %v2782_v3 = vcombine.high (!%p2777_p11), %v325_v0, %v329_v1  ;;  %v2781_v5 = vcombine.low (!%p2777_p11), %v325_v0, %v329_v1  ;;  %v333_v6 = vld [vmem:[#allocation6 + $0x40] sm:$0xff] (!%p2777_p11)  ;;  %v2784_v8 = vcombine.high (!%p2777_p11), %v326_v2, %v330_v4  ;;  %v2783_v9 = vcombine.low (!%p2777_p11), %v326_v2, %v330_v4  ;;  %v334_v11 = vld [vmem:[#allocation6 + $0x48] sm:$0xff] (!%p2777_p11) }
  0x8f   : > { %v337_v7 = vld [vmem:[#allocation6 + $0x60] sm:$0xff] (!%p2777_p11)  ;;  %v338_v12 = vld [vmem:[#allocation6 + $0x68] sm:$0xff] (!%p2777_p11)  ;;  %1562 = vmatprep.mubr.bf16.mxu0 (!%p2777_p11), %v3815_v57  ;;  %1644 = vmatprep.mubr.bf16.mxu1 (!%p2777_p11), %v3815_v57 }
  0x90   : > { %v2790_v10 = vcombine.high (!%p2777_p11), %v333_v6, %v337_v7  ;;  %v341_v13 = vld [vmem:[#allocation6 + $0x80] sm:$0xff] (!%p2777_p11)  ;;  %1530 = vmatprep.subr.bf16.mxu0 (!%p2777_p11), %v2782_v3  ;;  %v2792_v14 = vcombine.high (!%p2777_p11), %v334_v11, %v338_v12  ;;  %v342_v16 = vld [vmem:[#allocation6 + $0x88] sm:$0xff] (!%p2777_p11)  ;;  %1612 = vmatprep.subr.bf16.mxu1 (!%p2777_p11), %v2784_v8  ;;  %v2789_v18 = vcombine.low (!%p2777_p11), %v333_v6, %v337_v7 }
  0x91   : > { %v345_v15 = vld [vmem:[#allocation6 + $0xa0] sm:$0xff] (!%p2777_p11)  ;;  %v346_v17 = vld [vmem:[#allocation6 + $0xa8] sm:$0xff] (!%p2777_p11)  ;;  %1531 = vmatpush1.bf16.msra.mxu0 (!%p2777_p11), %v2781_v5  ;;  %1613 = vmatpush1.bf16.msra.mxu1 (!%p2777_p11), %v2783_v9  ;;  %v2791_v19 = vcombine.low (!%p2777_p11), %v334_v11, %v338_v12 }
  0x92   : > { %1532 = vmatprep.subr.bf16.mxu0 (!%p2777_p11), %v2790_v10  ;;  %v2798_v20 = vcombine.high (!%p2777_p11), %v341_v13, %v345_v15  ;;  %1614 = vmatprep.subr.bf16.mxu1 (!%p2777_p11), %v2792_v14  ;;  %v2800_v21 = vcombine.high (!%p2777_p11), %v342_v16, %v346_v17  ;;  %v349_v22 = vld [vmem:[#allocation6 + $0xc0] sm:$0xff] (!%p2777_p11)  ;;  %v350_v24 = vld [vmem:[#allocation6 + $0xc8] sm:$0xff] (!%p2777_p11)  ;;  %v2797_v26 = vcombine.low (!%p2777_p11), %v341_v13, %v345_v15 }
  0x93   : > { %v353_v23 = vld [vmem:[#allocation6 + $0xe0] sm:$0xff]  ;;  %v354_v25 = vld [vmem:[#allocation6 + $0xe8] sm:$0xff]  ;;  %v2799_v27 = vcombine.low %v342_v16, %v346_v17 }
  0x94   : > { %v2806_v28 = vcombine.high %v349_v22, %v353_v23  ;;  %v2808_v29 = vcombine.high %v350_v24, %v354_v25  ;;  %v357_v30 = vld [vmem:[#allocation6 + $0x100] sm:$0xff]  ;;  %v358_v32 = vld [vmem:[#allocation6 + $0x108] sm:$0xff]  ;;  %v2805_v34 = vcombine.low %v349_v22, %v353_v23  ;;  %v2807_v35 = vcombine.low %v350_v24, %v354_v25 }
  0x95   : > { %1533 = vmatpush1.bf16.msra.mxu0 %v2789_v18  ;;  %1615 = vmatpush1.bf16.msra.mxu1 %v2791_v19  ;;  %v361_v31 = vld [vmem:[#allocation6 + $0x120] sm:$0xff]  ;;  %v362_v33 = vld [vmem:[#allocation6 + $0x128] sm:$0xff] }
  0x96   : > { %1534 = vmatprep.subr.bf16.mxu0 %v2798_v20  ;;  %1616 = vmatprep.subr.bf16.mxu1 %v2800_v21  ;;  %v2814_v36 = vcombine.high %v357_v30, %v361_v31  ;;  %v2816_v37 = vcombine.high %v358_v32, %v362_v33  ;;  %v365_v38 = vld [vmem:[#allocation6 + $0x140] sm:$0xff]  ;;  %v366_v40 = vld [vmem:[#allocation6 + $0x148] sm:$0xff]  ;;  %v2813_v42 = vcombine.low %v357_v30, %v361_v31 }
  0x97   : > { %v369_v39 = vld [vmem:[#allocation6 + $0x160] sm:$0xff]  ;;  %v370_v41 = vld [vmem:[#allocation6 + $0x168] sm:$0xff]  ;;  %v2815_v43 = vcombine.low %v358_v32, %v362_v33 }
  0x98   : > { %v2822_v44 = vcombine.high %v365_v38, %v369_v39  ;;  %v2824_v45 = vcombine.high %v366_v40, %v370_v41  ;;  %v373_v46 = vld [vmem:[#allocation6 + $0x180] sm:$0xff]  ;;  %v374_v48 = vld [vmem:[#allocation6 + $0x188] sm:$0xff]  ;;  %v2821_v50 = vcombine.low %v365_v38, %v369_v39  ;;  %v2823_v51 = vcombine.low %v366_v40, %v370_v41 }
  0x99   : > { %1535 = vmatpush1.bf16.msra.mxu0 %v2797_v26  ;;  %1617 = vmatpush1.bf16.msra.mxu1 %v2799_v27  ;;  %v377_v47 = vld [vmem:[#allocation6 + $0x1a0] sm:$0xff]  ;;  %v378_v49 = vld [vmem:[#allocation6 + $0x1a8] sm:$0xff] }
  0x9a   : > { %1536 = vmatprep.subr.bf16.mxu0 %v2806_v28  ;;  %1618 = vmatprep.subr.bf16.mxu1 %v2808_v29  ;;  %v2830_v52 = vcombine.high %v373_v46, %v377_v47  ;;  %v2832_v54 = vcombine.high %v374_v48, %v378_v49  ;;  %v381_v55 = vld [vmem:[#allocation6 + $0x1c0] sm:$0xff]  ;;  %v382_v58 = vld [vmem:[#allocation6 + $0x1c8] sm:$0xff]  ;;  %v2829_v60 = vcombine.low %v373_v46, %v377_v47 }
  0x9b   : > { %v385_v56 = vld [vmem:[#allocation6 + $0x1e0] sm:$0xff]  ;;  %v386_v59 = vld [vmem:[#allocation6 + $0x1e8] sm:$0xff]  ;;  %v2831_v61 = vcombine.low %v374_v48, %v378_v49 }
  0x9c   : > { %v2838_v62 = vcombine.high %v381_v55, %v385_v56  ;;  %v2840_v63 = vcombine.high %v382_v58, %v386_v59  ;;  %v389_v0 = vld [vmem:[#allocation6 + $0x200] sm:$0xff]  ;;  %v390_v2 = vld [vmem:[#allocation6 + $0x208] sm:$0xff]  ;;  %v2837_v4 = vcombine.low %v381_v55, %v385_v56  ;;  %v2839_v5 = vcombine.low %v382_v58, %v386_v59 }
  0x9d   : > { %1537 = vmatpush1.bf16.msra.mxu0 %v2805_v34  ;;  %1619 = vmatpush1.bf16.msra.mxu1 %v2807_v35  ;;  %v393_v1 = vld [vmem:[#allocation6 + $0x220] sm:$0xff]  ;;  %v394_v3 = vld [vmem:[#allocation6 + $0x228] sm:$0xff] }
  0x9e   : > { %1538 = vmatprep.subr.bf16.mxu0 %v2814_v36  ;;  %1620 = vmatprep.subr.bf16.mxu1 %v2816_v37  ;;  %v2846_v6 = vcombine.high %v389_v0, %v393_v1  ;;  %v2848_v7 = vcombine.high %v390_v2, %v394_v3  ;;  %v397_v8 = vld [vmem:[#allocation6 + $0x240] sm:$0xff]  ;;  %v398_v10 = vld [vmem:[#allocation6 + $0x248] sm:$0xff]  ;;  %v2845_v12 = vcombine.low %v389_v0, %v393_v1 }
  0x9f   : > { %v401_v9 = vld [vmem:[#allocation6 + $0x260] sm:$0xff]  ;;  %v402_v11 = vld [vmem:[#allocation6 + $0x268] sm:$0xff]  ;;  %v2847_v13 = vcombine.low %v390_v2, %v394_v3 }
  0xa0   : > { %v2854_v14 = vcombine.high %v397_v8, %v401_v9  ;;  %v2856_v15 = vcombine.high %v398_v10, %v402_v11  ;;  %v405_v16 = vld [vmem:[#allocation6 + $0x280] sm:$0xff]  ;;  %v406_v18 = vld [vmem:[#allocation6 + $0x288] sm:$0xff]  ;;  %v2853_v20 = vcombine.low %v397_v8, %v401_v9  ;;  %v2855_v21 = vcombine.low %v398_v10, %v402_v11 }
  0xa1   : > { %1539 = vmatpush1.bf16.msra.mxu0 %v2813_v42  ;;  %1621 = vmatpush1.bf16.msra.mxu1 %v2815_v43  ;;  %v409_v17 = vld [vmem:[#allocation6 + $0x2a0] sm:$0xff]  ;;  %v410_v19 = vld [vmem:[#allocation6 + $0x2a8] sm:$0xff] }
  0xa2   : > { %1540 = vmatprep.subr.bf16.mxu0 %v2822_v44  ;;  %1622 = vmatprep.subr.bf16.mxu1 %v2824_v45  ;;  %v2862_v22 = vcombine.high %v405_v16, %v409_v17  ;;  %v2864_v23 = vcombine.high %v406_v18, %v410_v19  ;;  %v413_v24 = vld [vmem:[#allocation6 + $0x2c0] sm:$0xff]  ;;  %v414_v26 = vld [vmem:[#allocation6 + $0x2c8] sm:$0xff]  ;;  %v2861_v28 = vcombine.low %v405_v16, %v409_v17 }
  0xa3   : > { %v417_v25 = vld [vmem:[#allocation6 + $0x2e0] sm:$0xff]  ;;  %v418_v27 = vld [vmem:[#allocation6 + $0x2e8] sm:$0xff]  ;;  %v2863_v29 = vcombine.low %v406_v18, %v410_v19 }
  0xa4   : > { %v2870_v30 = vcombine.high %v413_v24, %v417_v25  ;;  %v2872_v31 = vcombine.high %v414_v26, %v418_v27  ;;  %v421_v32 = vld [vmem:[#allocation6 + $0x300] sm:$0xff]  ;;  %v422_v34 = vld [vmem:[#allocation6 + $0x308] sm:$0xff]  ;;  %v2869_v36 = vcombine.low %v413_v24, %v417_v25  ;;  %v2871_v37 = vcombine.low %v414_v26, %v418_v27 }
  0xa5   : > { %1541 = vmatpush1.bf16.msra.mxu0 %v2821_v50  ;;  %1623 = vmatpush1.bf16.msra.mxu1 %v2823_v51  ;;  %v425_v33 = vld [vmem:[#allocation6 + $0x320] sm:$0xff]  ;;  %v426_v35 = vld [vmem:[#allocation6 + $0x328] sm:$0xff] }
  0xa6   : > { %1542 = vmatprep.subr.bf16.mxu0 %v2830_v52  ;;  %1624 = vmatprep.subr.bf16.mxu1 %v2832_v54  ;;  %v2878_v38 = vcombine.high %v421_v32, %v425_v33  ;;  %v2880_v39 = vcombine.high %v422_v34, %v426_v35  ;;  %v429_v40 = vld [vmem:[#allocation6 + $0x340] sm:$0xff]  ;;  %v430_v42 = vld [vmem:[#allocation6 + $0x348] sm:$0xff]  ;;  %v2877_v44 = vcombine.low %v421_v32, %v425_v33 }
  0xa7   : > { %v433_v41 = vld [vmem:[#allocation6 + $0x360] sm:$0xff]  ;;  %v434_v43 = vld [vmem:[#allocation6 + $0x368] sm:$0xff]  ;;  %v2879_v45 = vcombine.low %v422_v34, %v426_v35 }
  0xa8   : > { %v2886_v46 = vcombine.high %v429_v40, %v433_v41  ;;  %v2888_v47 = vcombine.high %v430_v42, %v434_v43  ;;  %v437_v48 = vld [vmem:[#allocation6 + $0x380] sm:$0xff]  ;;  %v438_v50 = vld [vmem:[#allocation6 + $0x388] sm:$0xff]  ;;  %v2885_v52 = vcombine.low %v429_v40, %v433_v41  ;;  %v2887_v54 = vcombine.low %v430_v42, %v434_v43 }
  0xa9   : > { %1543 = vmatpush1.bf16.msra.mxu0 %v2829_v60  ;;  %1625 = vmatpush1.bf16.msra.mxu1 %v2831_v61  ;;  %v441_v49 = vld [vmem:[#allocation6 + $0x3a0] sm:$0xff]  ;;  %v442_v51 = vld [vmem:[#allocation6 + $0x3a8] sm:$0xff] }
  0xaa   : > { %1544 = vmatprep.subr.bf16.mxu0 %v2838_v62  ;;  %1626 = vmatprep.subr.bf16.mxu1 %v2840_v63  ;;  %v2894_v55 = vcombine.high %v437_v48, %v441_v49  ;;  %v2896_v56 = vcombine.high %v438_v50, %v442_v51  ;;  %v445_v58 = vld [vmem:[#allocation6 + $0x3c0] sm:$0xff]  ;;  %v446_v60 = vld [vmem:[#allocation6 + $0x3c8] sm:$0xff]  ;;  %v2893_v62 = vcombine.low %v437_v48, %v441_v49 }
  0xab   : > { %v449_v59 = vld [vmem:[#allocation6 + $0x3e0] sm:$0xff]  ;;  %v450_v61 = vld [vmem:[#allocation6 + $0x3e8] sm:$0xff]  ;;  %v2895_v63 = vcombine.low %v438_v50, %v442_v51 }
  0xac   : > { %v2902_v0 = vcombine.high %v445_v58, %v449_v59  ;;  %v2904_v1 = vcombine.high %v446_v60, %v450_v61  ;;  %v453_v2 = vld [vmem:[#allocation6 + $0x400] sm:$0xff] }
  0xad   : > { %1545 = vmatpush1.bf16.msra.mxu0 %v2837_v4  ;;  %1627 = vmatpush1.bf16.msra.mxu1 %v2839_v5  ;;  %v457_v3 = vld [vmem:[#allocation6 + $0x420] sm:$0xff]  ;;  %v454_v4 = vld [vmem:[#allocation6 + $0x408] sm:$0xff] }
  0xae   : > { %1546 = vmatprep.subr.bf16.mxu0 %v2846_v6  ;;  %1628 = vmatprep.subr.bf16.mxu1 %v2848_v7  ;;  %v458_v5 = vld [vmem:[#allocation6 + $0x428] sm:$0xff]  ;;  %v2901_v6 = vcombine.low %v445_v58, %v449_v59  ;;  %v2903_v7 = vcombine.low %v446_v60, %v450_v61  ;;  %v2910_v8 = vcombine.high %v453_v2, %v457_v3  ;;  %v461_v10 = vld [vmem:[#allocation6 + $0x440] sm:$0xff] }
  0xaf   : > { %v2912_v9 = vcombine.high %v454_v4, %v458_v5  ;;  %v465_v11 = vld [vmem:[#allocation6 + $0x460] sm:$0xff]  ;;  %v2911_v16 = vcombine.low %v454_v4, %v458_v5  ;;  %v327_v5 = vld [vmem:[#allocation6 + $0x10] sm:$0xff] }
  0xb0   : > { %v2918_v17 = vcombine.high %v461_v10, %v465_v11  ;;  %v469_v19 = vld [vmem:[#allocation6 + $0x480] sm:$0xff] }
  0xb1   : > { %1547 = vmatpush1.bf16.msra.mxu0 %v2845_v12  ;;  %1629 = vmatpush1.bf16.msra.mxu1 %v2847_v13  ;;  %v3821_v12 = vcombine.low %v3811_v53, %v3811_v53  ;;  %v462_v13 = vld [vmem:[#allocation6 + $0x448] sm:$0xff]  ;;  %v2917_v53 = vcombine.low %v461_v10, %v465_v11  ;;  %v477_v26 = vld [vmem:[#allocation6 + $0x4c0] sm:$0xff] }
  0xb2   : > { %1548 = vmatprep.subr.bf16.mxu0 %v2854_v14  ;;  %1630 = vmatprep.subr.bf16.mxu1 %v2856_v15  ;;  %v466_v14 = vld [vmem:[#allocation6 + $0x468] sm:$0xff]  ;;  %v2909_v15 = vcombine.low %v453_v2, %v457_v3  ;;  %v481_v27 = vld [vmem:[#allocation6 + $0x4e0] sm:$0xff] }
  0xb3   : > { %v2920_v18 = vcombine.high %v462_v13, %v466_v14  ;;  %v2934_v33 = vcombine.high %v477_v26, %v481_v27  ;;  %v485_v35 = vld [vmem:[#allocation6 + $0x500] sm:$0xff] }
  0xb4   : > { %v493_v43 = vld [vmem:[#allocation6 + $0x540] sm:$0xff] }
  0xb5   : > { %1549 = vmatpush1.bf16.msra.mxu0 %v2853_v20  ;;  %1631 = vmatpush1.bf16.msra.mxu1 %v2855_v21  ;;  %v473_v20 = vld [vmem:[#allocation6 + $0x4a0] sm:$0xff]  ;;  %v470_v21 = vld [vmem:[#allocation6 + $0x488] sm:$0xff] }
  0xb6   : > { %1550 = vmatprep.subr.bf16.mxu0 %v2862_v22  ;;  %1632 = vmatprep.subr.bf16.mxu1 %v2864_v23  ;;  %v474_v22 = vld [vmem:[#allocation6 + $0x4a8] sm:$0xff]  ;;  %v2919_v23 = vcombine.low %v462_v13, %v466_v14  ;;  %v2926_v24 = vcombine.high %v469_v19, %v473_v20  ;;  %v501_v51 = vld [vmem:[#allocation6 + $0x580] sm:$0xff]  ;;  %v335_v14 = vld [vmem:[#allocation6 + $0x50] sm:$0xff] }
  0xb7   : > { %v2928_v25 = vcombine.high %v470_v21, %v474_v22  ;;  %v2927_v32 = vcombine.low %v470_v21, %v474_v22  ;;  %v509_v61 = vld [vmem:[#allocation6 + $0x5c0] sm:$0xff] }
  0xb9   : > { %1551 = vmatpush1.bf16.msra.mxu0 %v2861_v28  ;;  %1633 = vmatpush1.bf16.msra.mxu1 %v2863_v29  ;;  %v3559_v28 = vmov 0   ;;  %v478_v29 = vld [vmem:[#allocation6 + $0x4c8] sm:$0xff] }
  0xba   : > { %1552 = vmatprep.subr.bf16.mxu0 %v2870_v30  ;;  %1634 = vmatprep.subr.bf16.mxu1 %v2872_v31  ;;  %v482_v30 = vld [vmem:[#allocation6 + $0x4e8] sm:$0xff]  ;;  %v2925_v31 = vcombine.low %v469_v19, %v473_v20 }
  0xbb   : > { %v2936_v34 = vcombine.high %v478_v29, %v482_v30  ;;  %v2935_v40 = vcombine.low %v478_v29, %v482_v30 }
  0xbd   : > { %1553 = vmatpush1.bf16.msra.mxu0 %v2869_v36  ;;  %1635 = vmatpush1.bf16.msra.mxu1 %v2871_v37  ;;  %v489_v36 = vld [vmem:[#allocation6 + $0x520] sm:$0xff]  ;;  %v486_v37 = vld [vmem:[#allocation6 + $0x508] sm:$0xff] }
  0xbe   : > { %1554 = vmatprep.subr.bf16.mxu0 %v2878_v38  ;;  %1636 = vmatprep.subr.bf16.mxu1 %v2880_v39  ;;  %v490_v38 = vld [vmem:[#allocation6 + $0x528] sm:$0xff]  ;;  %v2933_v39 = vcombine.low %v477_v26, %v481_v27  ;;  %v2942_v41 = vcombine.high %v485_v35, %v489_v36 }
  0xbf   : > { %v2944_v42 = vcombine.high %v486_v37, %v490_v38  ;;  %v2943_v48 = vcombine.low %v486_v37, %v490_v38 }
  0xc1   : > { %1555 = vmatpush1.bf16.msra.mxu0 %v2877_v44  ;;  %1637 = vmatpush1.bf16.msra.mxu1 %v2879_v45  ;;  %v497_v44 = vld [vmem:[#allocation6 + $0x560] sm:$0xff]  ;;  %v494_v45 = vld [vmem:[#allocation6 + $0x548] sm:$0xff] }
  0xc2   : > { %1556 = vmatprep.subr.bf16.mxu0 %v2886_v46  ;;  %1638 = vmatprep.subr.bf16.mxu1 %v2888_v47  ;;  %v498_v46 = vld [vmem:[#allocation6 + $0x568] sm:$0xff]  ;;  %v2941_v47 = vcombine.low %v485_v35, %v489_v36  ;;  %v2950_v49 = vcombine.high %v493_v43, %v497_v44 }
  0xc3   : > { %v2952_v50 = vcombine.high %v494_v45, %v498_v46  ;;  %v2951_v58 = vcombine.low %v494_v45, %v498_v46  ;;  %v367_v46 = vld [vmem:[#allocation6 + $0x150] sm:$0xff] }
  0xc5   : > { %1557 = vmatpush1.bf16.msra.mxu0 %v2885_v52  ;;  %1639 = vmatpush1.bf16.msra.mxu1 %v2887_v54  ;;  %v505_v52 = vld [vmem:[#allocation6 + $0x5a0] sm:$0xff]  ;;  %v502_v54 = vld [vmem:[#allocation6 + $0x588] sm:$0xff] }
  0xc6   : > { %1558 = vmatprep.subr.bf16.mxu0 %v2894_v55  ;;  %1640 = vmatprep.subr.bf16.mxu1 %v2896_v56  ;;  %v506_v55 = vld [vmem:[#allocation6 + $0x5a8] sm:$0xff]  ;;  %v2949_v56 = vcombine.low %v493_v43, %v497_v44  ;;  %v2958_v59 = vcombine.high %v501_v51, %v505_v52 }
  0xc7   : > { %v2960_v60 = vcombine.high %v502_v54, %v506_v55  ;;  %v2959_v2 = vcombine.low %v502_v54, %v506_v55  ;;  %v375_v55 = vld [vmem:[#allocation6 + $0x190] sm:$0xff] }
  0xc9   : > { %1559 = vmatpush1.bf16.msra.mxu0 %v2893_v62  ;;  %1641 = vmatpush1.bf16.msra.mxu1 %v2895_v63  ;;  %v513_v62 = vld [vmem:[#allocation6 + $0x5e0] sm:$0xff]  ;;  %v510_v63 = vld [vmem:[#allocation6 + $0x5c8] sm:$0xff] }
  0xca   : > { %1560 = vmatprep.subr.bf16.mxu0 %v2902_v0  ;;  %1642 = vmatprep.subr.bf16.mxu1 %v2904_v1  ;;  %v514_v0 = vld [vmem:[#allocation6 + $0x5e8] sm:$0xff]  ;;  %v2957_v1 = vcombine.low %v501_v51, %v505_v52  ;;  %v2966_v3 = vcombine.high %v509_v61, %v513_v62 }
  0xcb   : > { %v2968_v4 = vcombine.high %v510_v63, %v514_v0  ;;  %v2967_v10 = vcombine.low %v510_v63, %v514_v0  ;;  %v383_v0 = vld [vmem:[#allocation6 + $0x1d0] sm:$0xff] }
  0xcd   : > { %1561 = vmatpush1.bf16.msra.mxu0 %v2901_v6  ;;  %1643 = vmatpush1.bf16.msra.mxu1 %v2903_v7  ;;  %v331_v6 = vld [vmem:[#allocation6 + $0x30] sm:$0xff]  ;;  %v328_v7 = vld [vmem:[#allocation6 + $0x18] sm:$0xff] }
  0xce   : > { %1571 = vmatprep.subr.bf16.mxu0 %v2910_v8  ;;  %1653 = vmatprep.subr.bf16.mxu1 %v2912_v9  ;;  %v332_v8 = vld [vmem:[#allocation6 + $0x38] sm:$0xff]  ;;  %v2965_v9 = vcombine.low %v509_v61, %v513_v62  ;;  %v2786_v11 = vcombine.high %v327_v5, %v331_v6  ;;  %v2785_v19 = vcombine.low %v327_v5, %v331_v6 }
  0xcf   : > { %v2788_v13 = vcombine.high %v328_v7, %v332_v8  ;;  %v2787_v20 = vcombine.low %v328_v7, %v332_v8  ;;  %v391_v8 = vld [vmem:[#allocation6 + $0x210] sm:$0xff] }
  0xd0   : > { %1563 = vmatmul.mubr.bf16.vlgmr.msra.gmra.mrb[0].mxu0 %v3821_v12  ;;  %1645 = vmatmul.mubr.bf16.vlgmr.msra.gmra.mrb[0].mxu1 %v3821_v12 }
  0xd1   : > { %1572 = vmatpush1.bf16.msra.mxu0 %v2909_v15  ;;  %1654 = vmatpush1.bf16.msra.mxu1 %v2911_v16  ;;  %v339_v15 = vld [vmem:[#allocation6 + $0x70] sm:$0xff]  ;;  %v3827_v16 = vld [vmem:[#allocation3 + $0x8] ss:$0 sps:$4 sm:$0xff]  }
  0xd2   : > { %1573 = vmatprep.subr.bf16.mxu0 %v2918_v17  ;;  %1655 = vmatprep.subr.bf16.mxu1 %v2920_v18  ;;  %v336_v17 = vld [vmem:[#allocation6 + $0x58] sm:$0xff]  ;;  %v2794_v21 = vcombine.high %v335_v14, %v339_v15  ;;  %v2793_v26 = vcombine.low %v335_v14, %v339_v15 }
  0xd3   : > { %1603 = vmatprep.mubr.bf16.mxu0 %v3559_v28  ;;  %1685 = vmatprep.mubr.bf16.mxu1 %v3559_v28  ;;  %v340_v18 = vld [vmem:[#allocation6 + $0x78] sm:$0xff] }
  0xd4   : > { %v2796_v22 = vcombine.high %v336_v17, %v340_v18  ;;  %v2795_v27 = vcombine.low %v336_v17, %v340_v18  ;;  %v399_v18 = vld [vmem:[#allocation6 + $0x250] sm:$0xff] }
  0xd5   : > { %1574 = vmatpush1.bf16.msra.mxu0 %v2917_v53  ;;  %1656 = vmatpush1.bf16.msra.mxu1 %v2919_v23  ;;  %v343_v53 = vld [vmem:[#allocation6 + $0x90] sm:$0xff] }
  0xd6   : > { %1575 = vmatprep.subr.bf16.mxu0 %v2926_v24  ;;  %1657 = vmatprep.subr.bf16.mxu1 %v2928_v25  ;;  %v347_v23 = vld [vmem:[#allocation6 + $0xb0] sm:$0xff]  ;;  %v344_v24 = vld [vmem:[#allocation6 + $0x98] sm:$0xff] }
  0xd7   : > { %v348_v25 = vld [vmem:[#allocation6 + $0xb8] sm:$0xff]  ;;  %v2802_v29 = vcombine.high %v343_v53, %v347_v23  ;;  %v2801_v35 = vcombine.low %v343_v53, %v347_v23 }
  0xd8   : > { %v2804_v30 = vcombine.high %v344_v24, %v348_v25  ;;  %v2803_v36 = vcombine.low %v344_v24, %v348_v25  ;;  %v407_v25 = vld [vmem:[#allocation6 + $0x290] sm:$0xff] }
  0xd9   : > { %1576 = vmatpush1.bf16.msra.mxu0 %v2925_v31  ;;  %1658 = vmatpush1.bf16.msra.mxu1 %v2927_v32  ;;  %v351_v31 = vld [vmem:[#allocation6 + $0xd0] sm:$0xff] }
  0xda   : > { %1577 = vmatprep.subr.bf16.mxu0 %v2934_v33  ;;  %1659 = vmatprep.subr.bf16.mxu1 %v2936_v34  ;;  %v355_v32 = vld [vmem:[#allocation6 + $0xf0] sm:$0xff]  ;;  %v352_v33 = vld [vmem:[#allocation6 + $0xd8] sm:$0xff] }
  0xdb   : > { %v356_v34 = vld [vmem:[#allocation6 + $0xf8] sm:$0xff]  ;;  %v2810_v37 = vcombine.high %v351_v31, %v355_v32  ;;  %v2809_v43 = vcombine.low %v351_v31, %v355_v32 }
  0xdc   : > { %v2812_v38 = vcombine.high %v352_v33, %v356_v34  ;;  %v2811_v44 = vcombine.low %v352_v33, %v356_v34  ;;  %v415_v34 = vld [vmem:[#allocation6 + $0x2d0] sm:$0xff] }
  0xdd   : > { %1578 = vmatpush1.bf16.msra.mxu0 %v2933_v39  ;;  %1660 = vmatpush1.bf16.msra.mxu1 %v2935_v40  ;;  %v359_v39 = vld [vmem:[#allocation6 + $0x110] sm:$0xff] }
  0xde   : > { %1579 = vmatprep.subr.bf16.mxu0 %v2942_v41  ;;  %1661 = vmatprep.subr.bf16.mxu1 %v2944_v42  ;;  %v363_v40 = vld [vmem:[#allocation6 + $0x130] sm:$0xff]  ;;  %v360_v41 = vld [vmem:[#allocation6 + $0x118] sm:$0xff] }
  0xdf   : > { %v364_v42 = vld [vmem:[#allocation6 + $0x138] sm:$0xff]  ;;  %v2818_v45 = vcombine.high %v359_v39, %v363_v40 }
  0xe0   : > { %v2819_v51 = vcombine.low %v360_v41, %v364_v42 }
  0xe1   : > { %1580 = vmatpush1.bf16.msra.mxu0 %v2941_v47  ;;  %1662 = vmatpush1.bf16.msra.mxu1 %v2943_v48  ;;  %v371_v47 = vld [vmem:[#allocation6 + $0x170] sm:$0xff]  ;;  %v368_v48 = vld [vmem:[#allocation6 + $0x158] sm:$0xff] }
  0xe2   : > { %1581 = vmatprep.subr.bf16.mxu0 %v2950_v49  ;;  %1663 = vmatprep.subr.bf16.mxu1 %v2952_v50  ;;  %v372_v49 = vld [vmem:[#allocation6 + $0x178] sm:$0xff]  ;;  %v2817_v50 = vcombine.low %v359_v39, %v363_v40  ;;  %v2826_v52 = vcombine.high %v367_v46, %v371_v47 }
  0xe3   : > { %v2828_v54 = vcombine.high %v368_v48, %v372_v49  ;;  %v2827_v61 = vcombine.low %v368_v48, %v372_v49  ;;  %v431_v49 = vld [vmem:[#allocation6 + $0x350] sm:$0xff] }
  0xe5   : > { %1582 = vmatpush1.bf16.msra.mxu0 %v2949_v56  ;;  %1664 = vmatpush1.bf16.msra.mxu1 %v2951_v58  ;;  %v379_v56 = vld [vmem:[#allocation6 + $0x1b0] sm:$0xff]  ;;  %v376_v58 = vld [vmem:[#allocation6 + $0x198] sm:$0xff] }
  0xe6   : > { %1583 = vmatprep.subr.bf16.mxu0 %v2958_v59  ;;  %1665 = vmatprep.subr.bf16.mxu1 %v2960_v60  ;;  %v380_v59 = vld [vmem:[#allocation6 + $0x1b8] sm:$0xff]  ;;  %v2825_v60 = vcombine.low %v367_v46, %v371_v47  ;;  %v2834_v62 = vcombine.high %v375_v55, %v379_v56 }
  0xe7   : > { %v2836_v63 = vcombine.high %v376_v58, %v380_v59  ;;  %v2835_v5 = vcombine.low %v376_v58, %v380_v59  ;;  %v439_v59 = vld [vmem:[#allocation6 + $0x390] sm:$0xff] }
  0xe9   : > { %1584 = vmatpush1.bf16.msra.mxu0 %v2957_v1  ;;  %1666 = vmatpush1.bf16.msra.mxu1 %v2959_v2  ;;  %v387_v1 = vld [vmem:[#allocation6 + $0x1f0] sm:$0xff]  ;;  %v384_v2 = vld [vmem:[#allocation6 + $0x1d8] sm:$0xff] }
  0xea   : > { %1585 = vmatprep.subr.bf16.mxu0 %v2966_v3  ;;  %1667 = vmatprep.subr.bf16.mxu1 %v2968_v4  ;;  %v388_v3 = vld [vmem:[#allocation6 + $0x1f8] sm:$0xff]  ;;  %v2833_v4 = vcombine.low %v375_v55, %v379_v56  ;;  %v2842_v6 = vcombine.high %v383_v0, %v387_v1 }
  0xeb   : > { %v2844_v7 = vcombine.high %v384_v2, %v388_v3  ;;  %v2843_v14 = vcombine.low %v384_v2, %v388_v3  ;;  %v447_v3 = vld [vmem:[#allocation6 + $0x3d0] sm:$0xff] }
  0xed   : > { %1586 = vmatpush1.bf16.msra.mxu0 %v2965_v9  ;;  %1668 = vmatpush1.bf16.msra.mxu1 %v2967_v10  ;;  %v395_v9 = vld [vmem:[#allocation6 + $0x230] sm:$0xff]  ;;  %v392_v10 = vld [vmem:[#allocation6 + $0x218] sm:$0xff] }
  0xee   : > { %1694 = vmatprep.subr.bf16.mxu0 %v2786_v11  ;;  %1776 = vmatprep.subr.bf16.mxu1 %v2788_v13  ;;  %v396_v11 = vld [vmem:[#allocation6 + $0x238] sm:$0xff]  ;;  %v2841_v13 = vcombine.low %v383_v0, %v387_v1  ;;  %v2850_v15 = vcombine.high %v391_v8, %v395_v9 }
  0xef   : > { %v2852_v17 = vcombine.high %v392_v10, %v396_v11  ;;  %v2851_v53 = vcombine.low %v392_v10, %v396_v11  ;;  %v455_v11 = vld [vmem:[#allocation6 + $0x410] sm:$0xff] }
  0xf0   : > { %1604 = vmatmul.mubr.bf16.vlgmr.msra.gmra.mrb[0].mxu0 %v3827_v16  ;;  %1686 = vmatmul.mubr.bf16.vlgmr.msra.gmra.mrb[0].mxu1 %v3827_v16 }
  0xf1   : > { %1695 = vmatpush1.bf16.msra.mxu0 %v2785_v19  ;;  %1777 = vmatpush1.bf16.msra.mxu1 %v2787_v20  ;;  %v403_v19 = vld [vmem:[#allocation6 + $0x270] sm:$0xff]  ;;  %v400_v20 = vld [vmem:[#allocation6 + $0x258] sm:$0xff] }
  0xf2   : > { %1696 = vmatprep.subr.bf16.mxu0 %v2794_v21  ;;  %1778 = vmatprep.subr.bf16.mxu1 %v2796_v22  ;;  %v404_v21 = vld [vmem:[#allocation6 + $0x278] sm:$0xff]  ;;  %v2849_v22 = vcombine.low %v391_v8, %v395_v9  ;;  %v2858_v23 = vcombine.high %v399_v18, %v403_v19 }
  0xf3   : > { %1726 = vmatprep.mubr.bf16.mxu0 %v3815_v57  ;;  %1808 = vmatprep.mubr.bf16.mxu1 %v3815_v57  ;;  %v2820_v57 = vcombine.high %v360_v41, %v364_v42  ;;  %v2860_v24 = vcombine.high %v400_v20, %v404_v21  ;;  %v2859_v31 = vcombine.low %v400_v20, %v404_v21  ;;  %v423_v42 = vld [vmem:[#allocation6 + $0x310] sm:$0xff] }
  0xf4   : > { %v463_v21 = vld [vmem:[#allocation6 + $0x450] sm:$0xff] }
  0xf5   : > { %1697 = vmatpush1.bf16.msra.mxu0 %v2793_v26  ;;  %1779 = vmatpush1.bf16.msra.mxu1 %v2795_v27  ;;  %v411_v26 = vld [vmem:[#allocation6 + $0x2b0] sm:$0xff]  ;;  %v408_v27 = vld [vmem:[#allocation6 + $0x298] sm:$0xff] }
  0xf6   : > { %1698 = vmatprep.subr.bf16.mxu0 %v2802_v29  ;;  %1780 = vmatprep.subr.bf16.mxu1 %v2804_v30  ;;  %v412_v29 = vld [vmem:[#allocation6 + $0x2b8] sm:$0xff]  ;;  %v2857_v30 = vcombine.low %v399_v18, %v403_v19  ;;  %v2866_v32 = vcombine.high %v407_v25, %v411_v26 }
  0xf7   : > { %v2868_v33 = vcombine.high %v408_v27, %v412_v29  ;;  %v2867_v39 = vcombine.low %v408_v27, %v412_v29  ;;  %v471_v29 = vld [vmem:[#allocation6 + $0x490] sm:$0xff] }
  0xf9   : > { %1699 = vmatpush1.bf16.msra.mxu0 %v2801_v35  ;;  %1781 = vmatpush1.bf16.msra.mxu1 %v2803_v36  ;;  %v419_v35 = vld [vmem:[#allocation6 + $0x2f0] sm:$0xff]  ;;  %v416_v36 = vld [vmem:[#allocation6 + $0x2d8] sm:$0xff] }
  0xfa   : > { %1700 = vmatprep.subr.bf16.mxu0 %v2810_v37  ;;  %1782 = vmatprep.subr.bf16.mxu1 %v2812_v38  ;;  %v420_v37 = vld [vmem:[#allocation6 + $0x2f8] sm:$0xff]  ;;  %v2865_v38 = vcombine.low %v407_v25, %v411_v26  ;;  %v2874_v40 = vcombine.high %v415_v34, %v419_v35 }
  0xfb   : > { %v2876_v41 = vcombine.high %v416_v36, %v420_v37  ;;  %v2875_v46 = vcombine.low %v416_v36, %v420_v37  ;;  %v479_v37 = vld [vmem:[#allocation6 + $0x4d0] sm:$0xff] }
  0xfd   : > { %1701 = vmatpush1.bf16.msra.mxu0 %v2809_v43  ;;  %1783 = vmatpush1.bf16.msra.mxu1 %v2811_v44  ;;  %v427_v43 = vld [vmem:[#allocation6 + $0x330] sm:$0xff]  ;;  %v424_v44 = vld [vmem:[#allocation6 + $0x318] sm:$0xff] }
  0xfe   : > { %1702 = vmatprep.subr.bf16.mxu0 %v2818_v45  ;;  %1784 = vmatprep.subr.bf16.mxu1 %v2820_v57  ;;  %v428_v45 = vld [vmem:[#allocation6 + $0x338] sm:$0xff]  ;;  %v2873_v57 = vcombine.low %v415_v34, %v419_v35  ;;  %v2882_v47 = vcombine.high %v423_v42, %v427_v43 }
  0xff   : > { %v2884_v48 = vcombine.high %v424_v44, %v428_v45  ;;  %v2883_v55 = vcombine.low %v424_v44, %v428_v45  ;;  %v487_v44 = vld [vmem:[#allocation6 + $0x510] sm:$0xff] }
 0x100   : > { %v491_v45 = vld [vmem:[#allocation6 + $0x530] sm:$0xff] }
 0x101   : > { %1703 = vmatpush1.bf16.msra.mxu0 %v2817_v50  ;;  %1785 = vmatpush1.bf16.msra.mxu1 %v2819_v51  ;;  %v435_v50 = vld [vmem:[#allocation6 + $0x370] sm:$0xff]  ;;  %v432_v51 = vld [vmem:[#allocation6 + $0x358] sm:$0xff] }
 0x102   : > { %1704 = vmatprep.subr.bf16.mxu0 %v2826_v52  ;;  %1786 = vmatprep.subr.bf16.mxu1 %v2828_v54  ;;  %v436_v52 = vld [vmem:[#allocation6 + $0x378] sm:$0xff]  ;;  %v2881_v54 = vcombine.low %v423_v42, %v427_v43  ;;  %v2890_v56 = vcombine.high %v431_v49, %v435_v50 }
 0x103   : > { %v2892_v58 = vcombine.high %v432_v51, %v436_v52  ;;  %v2891_v0 = vcombine.low %v432_v51, %v436_v52  ;;  %v499_v51 = vld [vmem:[#allocation6 + $0x570] sm:$0xff]  ;;  %v496_v52 = vld [vmem:[#allocation6 + $0x558] sm:$0xff] }
 0x105   : > { %1705 = vmatpush1.bf16.msra.mxu0 %v2825_v60  ;;  %1787 = vmatpush1.bf16.msra.mxu1 %v2827_v61  ;;  %v443_v60 = vld [vmem:[#allocation6 + $0x3b0] sm:$0xff]  ;;  %v440_v61 = vld [vmem:[#allocation6 + $0x398] sm:$0xff] }
 0x106   : > { %1706 = vmatprep.subr.bf16.mxu0 %v2834_v62  ;;  %1788 = vmatprep.subr.bf16.mxu1 %v2836_v63  ;;  %v444_v62 = vld [vmem:[#allocation6 + $0x3b8] sm:$0xff]  ;;  %v2889_v63 = vcombine.low %v431_v49, %v435_v50  ;;  %v2898_v1 = vcombine.high %v439_v59, %v443_v60  ;;  %v2946_v49 = vcombine.high %v487_v44, %v491_v45  ;;  %v495_v50 = vld [vmem:[#allocation6 + $0x550] sm:$0xff] }
 0x107   : > { %v2900_v2 = vcombine.high %v440_v61, %v444_v62  ;;  %v2899_v8 = vcombine.low %v440_v61, %v444_v62  ;;  %v507_v61 = vld [vmem:[#allocation6 + $0x5b0] sm:$0xff]  ;;  %v504_v62 = vld [vmem:[#allocation6 + $0x598] sm:$0xff] }
 0x109   : > { %1707 = vmatpush1.bf16.msra.mxu0 %v2833_v4  ;;  %1789 = vmatpush1.bf16.msra.mxu1 %v2835_v5  ;;  %v451_v4 = vld [vmem:[#allocation6 + $0x3f0] sm:$0xff]  ;;  %v448_v5 = vld [vmem:[#allocation6 + $0x3d8] sm:$0xff] }
 0x10a   : > { %1708 = vmatprep.subr.bf16.mxu0 %v2842_v6  ;;  %1790 = vmatprep.subr.bf16.mxu1 %v2844_v7  ;;  %v452_v6 = vld [vmem:[#allocation6 + $0x3f8] sm:$0xff]  ;;  %v2897_v7 = vcombine.low %v439_v59, %v443_v60  ;;  %v2906_v9 = vcombine.high %v447_v3, %v451_v4  ;;  %v503_v60 = vld [vmem:[#allocation6 + $0x590] sm:$0xff] }
 0x10b   : > { %v2908_v10 = vcombine.high %v448_v5, %v452_v6  ;;  %v2907_v18 = vcombine.low %v448_v5, %v452_v6  ;;  %v515_v5 = vld [vmem:[#allocation6 + $0x5f0] sm:$0xff]  ;;  %v512_v6 = vld [vmem:[#allocation6 + $0x5d8] sm:$0xff] }
 0x10d   : > { %1709 = vmatpush1.bf16.msra.mxu0 %v2841_v13  ;;  %1791 = vmatpush1.bf16.msra.mxu1 %v2843_v14  ;;  %v459_v13 = vld [vmem:[#allocation6 + $0x430] sm:$0xff]  ;;  %v456_v14 = vld [vmem:[#allocation6 + $0x418] sm:$0xff] }
 0x10e   : > { %1710 = vmatprep.subr.bf16.mxu0 %v2850_v15  ;;  %1792 = vmatprep.subr.bf16.mxu1 %v2852_v17  ;;  %v460_v15 = vld [vmem:[#allocation6 + $0x438] sm:$0xff]  ;;  %v2905_v17 = vcombine.low %v447_v3, %v451_v4  ;;  %v2914_v19 = vcombine.high %v455_v11, %v459_v13  ;;  %v511_v4 = vld [vmem:[#allocation6 + $0x5d0] sm:$0xff] }
 0x10f   : > { %v2916_v20 = vcombine.high %v456_v14, %v460_v15  ;;  %v2915_v25 = vcombine.low %v456_v14, %v460_v15  ;;  %v519_v15 = vlaneseq }
 0x111   : > { %1711 = vmatpush1.bf16.msra.mxu0 %v2849_v22  ;;  %1793 = vmatpush1.bf16.msra.mxu1 %v2851_v53  ;;  %v467_v22 = vld [vmem:[#allocation6 + $0x470] sm:$0xff]  ;;  %v464_v53 = vld [vmem:[#allocation6 + $0x458] sm:$0xff] }
 0x112   : > { %1712 = vmatprep.subr.bf16.mxu0 %v2858_v23  ;;  %1794 = vmatprep.subr.bf16.mxu1 %v2860_v24  ;;  %v468_v23 = vld [vmem:[#allocation6 + $0x478] sm:$0xff]  ;;  %v2913_v24 = vcombine.low %v455_v11, %v459_v13  ;;  %v2922_v26 = vcombine.high %v463_v21, %v467_v22  ;;  %v2969_v13 = vcombine.low %v511_v4, %v515_v5 }
 0x113   : > { %v2924_v27 = vcombine.high %v464_v53, %v468_v23  ;;  %v2923_v34 = vcombine.low %v464_v53, %v468_v23 }
 0x115   : > { %1713 = vmatpush1.bf16.msra.mxu0 %v2857_v30  ;;  %1795 = vmatpush1.bf16.msra.mxu1 %v2859_v31  ;;  %v475_v30 = vld [vmem:[#allocation6 + $0x4b0] sm:$0xff]  ;;  %v472_v31 = vld [vmem:[#allocation6 + $0x498] sm:$0xff] }
 0x116   : > { %1714 = vmatprep.subr.bf16.mxu0 %v2866_v32  ;;  %1796 = vmatprep.subr.bf16.mxu1 %v2868_v33  ;;  %v476_v32 = vld [vmem:[#allocation6 + $0x4b8] sm:$0xff]  ;;  %v2921_v33 = vcombine.low %v463_v21, %v467_v22  ;;  %v2930_v35 = vcombine.high %v471_v29, %v475_v30 }
 0x117   : > { %v2932_v36 = vcombine.high %v472_v31, %v476_v32 }
 0x119   : > { %1715 = vmatpush1.bf16.msra.mxu0 %v2865_v38  ;;  %1797 = vmatpush1.bf16.msra.mxu1 %v2867_v39  ;;  %v483_v38 = vld [vmem:[#allocation6 + $0x4f0] sm:$0xff]  ;;  %v480_v39 = vld [vmem:[#allocation6 + $0x4d8] sm:$0xff] }
 0x11a   : > { %1716 = vmatprep.subr.bf16.mxu0 %v2874_v40  ;;  %1798 = vmatprep.subr.bf16.mxu1 %v2876_v41  ;;  %v484_v40 = vld [vmem:[#allocation6 + $0x4f8] sm:$0xff]  ;;  %v2929_v41 = vcombine.low %v471_v29, %v475_v30  ;;  %v2938_v42 = vcombine.high %v479_v37, %v483_v38 }
 0x11b   : > { %v2940_v43 = vcombine.high %v480_v39, %v484_v40 }
 0x11d   : > { %1717 = vmatpush1.bf16.msra.mxu0 %v2873_v57  ;;  %1799 = vmatpush1.bf16.msra.mxu1 %v2875_v46  ;;  %v488_v57 = vld [vmem:[#allocation6 + $0x518] sm:$0xff] }
 0x11e   : > { %1718 = vmatprep.subr.bf16.mxu0 %v2882_v47  ;;  %1800 = vmatprep.subr.bf16.mxu1 %v2884_v48  ;;  %v492_v46 = vld [vmem:[#allocation6 + $0x538] sm:$0xff]  ;;  %v2937_v47 = vcombine.low %v479_v37, %v483_v38  ;;  %v2939_v48 = vcombine.low %v480_v39, %v484_v40 }
 0x121   : > { %1719 = vmatpush1.bf16.msra.mxu0 %v2881_v54  ;;  %1801 = vmatpush1.bf16.msra.mxu1 %v2883_v55  ;;  %v500_v54 = vld [vmem:[#allocation6 + $0x578] sm:$0xff]  ;;  %v2945_v55 = vcombine.low %v487_v44, %v491_v45 }
 0x122   : > { %1720 = vmatprep.subr.bf16.mxu0 %v2890_v56  ;;  %1802 = vmatprep.subr.bf16.mxu1 %v2892_v58  ;;  %v2947_v56 = vcombine.low %v488_v57, %v492_v46  ;;  %v2954_v58 = vcombine.high %v495_v50, %v499_v51  ;;  %v2956_v59 = vcombine.high %v496_v52, %v500_v54 }
 0x125   : > { %1721 = vmatpush1.bf16.msra.mxu0 %v2889_v63  ;;  %1803 = vmatpush1.bf16.msra.mxu1 %v2891_v0  ;;  %v508_v63 = vld [vmem:[#allocation6 + $0x5b8] sm:$0xff]  ;;  %v2953_v0 = vcombine.low %v495_v50, %v499_v51 }
 0x126   : > { %1722 = vmatprep.subr.bf16.mxu0 %v2898_v1  ;;  %1804 = vmatprep.subr.bf16.mxu1 %v2900_v2  ;;  %v2955_v1 = vcombine.low %v496_v52, %v500_v54  ;;  %v2962_v2 = vcombine.high %v503_v60, %v507_v61  ;;  %v2964_v3 = vcombine.high %v504_v62, %v508_v63 }
 0x129   : > { %1723 = vmatpush1.bf16.msra.mxu0 %v2897_v7  ;;  %1805 = vmatpush1.bf16.msra.mxu1 %v2899_v8  ;;  %v516_v7 = vld [vmem:[#allocation6 + $0x5f8] sm:$0xff]  ;;  %v2961_v8 = vcombine.low %v503_v60, %v507_v61 }
 0x12a   : > { %1724 = vmatprep.subr.bf16.mxu0 %v2906_v9  ;;  %1806 = vmatprep.subr.bf16.mxu1 %v2908_v10  ;;  %v2963_v9 = vcombine.low %v504_v62, %v508_v63  ;;  %v2970_v10 = vcombine.high %v511_v4, %v515_v5  ;;  %v2972_v11 = vcombine.high %v512_v6, %v516_v7 }
 0x12b   : > { %v2971_v14 = vcombine.low %v512_v6, %v516_v7 }
 0x12d   : > { %1725 = vmatpush1.bf16.msra.mxu0 %v2905_v17  ;;  %1807 = vmatpush1.bf16.msra.mxu1 %v2907_v18  ;;  %v520_v17 = vshrl.u32 %v519_v15, 7 }
 0x12e   : > { %1735 = vmatprep.subr.bf16.mxu0 %v2914_v19  ;;  %1817 = vmatprep.subr.bf16.mxu1 %v2916_v20  ;;  %v517_v19 = vld [vmem:[#allocation8] sm:$0xff] }
 0x12f   : > { %v521_v18 = vsub.s32 0, %v520_v17  ;;  %v529_v20 = vsub.s32 2, %v520_v17  ;;  %v525_v21 = vsub.s32 1, %v520_v17  ;;  %v533_v22 = vsub.s32 3, %v520_v17 }
 0x130   : > { %1727 = vmatmul.mubr.bf16.vlgmr.msra.gmra.mrb[4].mxu0 %v3821_v12  ;;  %1809 = vmatmul.mubr.bf16.vlgmr.msra.gmra.mrb[4].mxu1 %v3821_v12  ;;  %v2931_v12 = vcombine.low %v472_v31, %v476_v32  ;;  %v545_v44 = vsub.s32 6, %v520_v17  ;;  %v541_v45 = vsub.s32 5, %v520_v17 }
 0x131   : > { %1736 = vmatpush1.bf16.msra.mxu0 %v2913_v24  ;;  %1818 = vmatpush1.bf16.msra.mxu1 %v2915_v25  ;;  %v522_v53 = vrot.slane %v517_v19, %v521_v18  ;;  %v530_v23 = vrot.slane %v517_v19, %v529_v20  ;;  %v526_v24 = vrot.slane %v517_v19, %v525_v21 }
 0x132   : > { %1737 = vmatprep.subr.bf16.mxu0 %v2922_v26  ;;  %1819 = vmatprep.subr.bf16.mxu1 %v2924_v27  ;;  %v534_v25 = vrot.slane %v517_v19, %v533_v22 }
 0x133   : > { %1767 = vmatprep.mubr.bf16.mxu0 %v3559_v28  ;;  %1849 = vmatprep.mubr.bf16.mxu1 %v3559_v28  ;;  %v2948_v28 = vcombine.high %v488_v57, %v492_v46  ;;  %v549_v57 = vsub.s32 7, %v520_v17 }
 0x135   : > { %1738 = vmatpush1.bf16.msra.mxu0 %v2921_v33  ;;  %1820 = vmatpush1.bf16.msra.mxu1 %v2923_v34 }
 0x136   : > { %1739 = vmatprep.subr.bf16.mxu0 %v2930_v35  ;;  %1821 = vmatprep.subr.bf16.mxu1 %v2932_v36 }
 0x139   : > { %1740 = vmatpush1.bf16.msra.mxu0 %v2929_v41  ;;  %1822 = vmatpush1.bf16.msra.mxu1 %v2931_v12 }
 0x13a   : > { %1741 = vmatprep.subr.bf16.mxu0 %v2938_v42  ;;  %1823 = vmatprep.subr.bf16.mxu1 %v2940_v43  ;;  %v537_v43 = vsub.s32 4, %v520_v17 }
 0x13c   : > { %v538_v46 = vrot.slane %v517_v19, %v537_v43 }
 0x13d   : > { %1742 = vmatpush1.bf16.msra.mxu0 %v2937_v47  ;;  %1824 = vmatpush1.bf16.msra.mxu1 %v2939_v48  ;;  %v546_v47 = vrot.slane %v517_v19, %v545_v44  ;;  %v542_v48 = vrot.slane %v517_v19, %v541_v45 }
 0x13e   : > { %1743 = vmatprep.subr.bf16.mxu0 %v2946_v49  ;;  %1825 = vmatprep.subr.bf16.mxu1 %v2948_v28  ;;  %v550_v49 = vrot.slane %v517_v19, %v549_v57 }
 0x141   : > { %1744 = vmatpush1.bf16.msra.mxu0 %v2945_v55  ;;  %1826 = vmatpush1.bf16.msra.mxu1 %v2947_v56 }
 0x142   : > { %1745 = vmatprep.subr.bf16.mxu0 %v2954_v58  ;;  %1827 = vmatprep.subr.bf16.mxu1 %v2956_v59 }
 0x145   : > { %1746 = vmatpush1.bf16.msra.mxu0 %v2953_v0  ;;  %1828 = vmatpush1.bf16.msra.mxu1 %v2955_v1 }
 0x146   : > { %1747 = vmatprep.subr.bf16.mxu0 %v2962_v2  ;;  %1829 = vmatprep.subr.bf16.mxu1 %v2964_v3 }
 0x149   : > { %1748 = vmatpush1.bf16.msra.mxu0 %v2961_v8  ;;  %1830 = vmatpush1.bf16.msra.mxu1 %v2963_v9 }
 0x14a   : > { %1749 = vmatprep.subr.bf16.mxu0 %v2970_v10  ;;  %1831 = vmatprep.subr.bf16.mxu1 %v2972_v11 }
 0x14d   : > { %1750 = vmatpush1.bf16.msra.mxu0 %v2969_v13  ;;  %1832 = vmatpush1.bf16.msra.mxu1 %v2971_v14 }
 0x150   : > { %1768 = vmatmul.mubr.bf16.vlgmr.msra.gmra.mrb[4].mxu0 %v3827_v16  ;;  %1850 = vmatmul.mubr.bf16.vlgmr.msra.gmra.mrb[4].mxu1 %v3827_v16 }
 0x1c3   : > { %v1605_v26 = vpop.f32.mrb[0].mxu0  ;;  %v1687_v29 = vpop.f32.mrb[0].mxu1 }
 0x1c4   : > { %v3146_v27 = vadd.f32 %v1605_v26, %v522_v53  ;;  %v1607_v30 = vpop.f32.mrb[1].mxu0  ;;  %v3148_v31 = vadd.f32 %v1687_v29, %v530_v23  ;;  %v1689_v33 = vpop.f32.mrb[1].mxu1 }
 0x1c5   : > { %v3147_v32 = vadd.f32 %v1607_v30, %v526_v24  ;;  %v1609_v34 = vpop.f32.mrb[2].mxu0  ;;  %v3149_v35 = vadd.f32 %v1689_v33, %v534_v25  ;;  %v1691_v36 = vpop.f32.mrb[2].mxu1 }
 0x1c6   : > { %v1858_v16 = vmax.f32 %v3146_v27, 0.0  ;;  %v1610_v37 = vpop.f32.mrb[3].mxu0  ;;  %v1860_v38 = vmax.f32 %v3148_v31, 0.0  ;;  %v1692_v40 = vpop.f32.mrb[3].mxu1 }
 0x1c7   : > { %v1859_v39 = vmax.f32 %v3147_v32, 0.0  ;;  %v1861_v41 = vmax.f32 %v3149_v35, 0.0 }
 0x1c9   : > { %v3054_v12 = vpack.c.bf16 %v1859_v39, %v1858_v16  ;;  %v3055_v42 = vpack.c.bf16 %v1861_v41, %v1860_v38 }
 0x1cb   : > { %1901 = vst [vmem:[#allocation2] sm:$0xff] %v3054_v12  ;;  %1902 = vst [vmem:[#allocation2 + $0x8] sm:$0xff] %v3055_v42 }
 0x223   : > { %v1769_v28 = vpop.f32.mrb[4].mxu0  ;;  %v1851_v51 = vpop.f32.mrb[4].mxu1 }
 0x224   : > { %v3150_v50 = vadd.f32 %v1769_v28, %v538_v46  ;;  %v1771_v52 = vpop.f32.mrb[5].mxu0  ;;  %v3152_v54 = vadd.f32 %v1851_v51, %v546_v47  ;;  %v1853_v56 = vpop.f32.mrb[5].mxu1 }
 0x225   : > { %v3151_v55 = vadd.f32 %v1771_v52, %v542_v48  ;;  %v1773_v58 = vpop.f32.mrb[6].mxu0  ;;  %v3153_v60 = vadd.f32 %v1853_v56, %v550_v49  ;;  %v1855_v61 = vpop.f32.mrb[6].mxu1 }
 0x226   : > { %v1862_v59 = vmax.f32 %v3150_v50, 0.0  ;;  %v1774_v62 = vpop.f32.mrb[7].mxu0  ;;  %v1864_v63 = vmax.f32 %v3152_v54, 0.0  ;;  %v1856_v1 = vpop.f32.mrb[7].mxu1 }
 0x227   : > { %v1863_v0 = vmax.f32 %v3151_v55, 0.0  ;;  %v1865_v2 = vmax.f32 %v3153_v60, 0.0 }
 0x229   : > { %v3056_v3 = vpack.c.bf16 %v1863_v0, %v1862_v59  ;;  %v3057_v4 = vpack.c.bf16 %v1865_v2, %v1864_v63 }
 0x22b   : > { %1903 = vst [vmem:[#allocation2 + $0x10] sm:$0xff] %v3056_v3  ;;  %1904 = vst [vmem:[#allocation2 + $0x18] sm:$0xff] %v3057_v4 }
 0x22c PF: > { %v3272_v5 = vld [vmem:[%s3793_s13 + $0x40] sm:$0xff]   ;;  %v3276_v9 = vld [vmem:[%s3793_s13 + $0x48] sm:$0xff]   ;;  %v3280_v14 = vld [vmem:[%s3793_s13 + $0x50] sm:$0xff]   ;;  %s3051_s27 = sshll.u32 %s3540_s21, 7  ;;  %s2636_s11 = sshll.u32 %s3808_s7, 4  ;;  %s3915_s11 = int_to_ptr.vmem [resolvable:$true] %s2636_s11 }
 0x22d   : > { %v3273_v6 = vld [vmem:[%s3793_s13 + $0xc0] sm:$0xff]   ;;  %3058 = vmatprep.subr.bf16.mxu0 %v3272_v5  ;;  %v3277_v10 = vld [vmem:[%s3793_s13 + $0xc8] sm:$0xff]   ;;  %v3281_v15 = vld [vmem:[%s3793_s13 + $0xd0] sm:$0xff]   ;;  %s3913_s14 = scalar_lea.hbm %s3968_s5, %s3051_s27  ;;  %s2621_s25 = scalar_lea.sflag [#allocation5], %s3789_s8 }
 0x22e   : > { %v3274_v7 = vld [vmem:[%s3793_s13] sm:$0xff]   ;;  %3080 = vmatprep.subr.bf16.mxu1 %v3273_v6  ;;  %v3278_v11 = vld [vmem:[%s3793_s13 + $0x8] sm:$0xff]   ;;  %v3282_v17 = vld [vmem:[%s3793_s13 + $0x10] sm:$0xff]   ;;  %s3458_s6 = scalar_lea.vmem %s3915_s11, 128  ;;  %p3995_p13 = scmp.ne.s32.totalorder %s3984_s29, 0 }
 0x22f   : > { %v3275_v8 = vld [vmem:[%s3793_s13 + $0x80] sm:$0xff]   ;;  %3059 = vmatpush3.bf16.msra.mxu0 %v3274_v7  ;;  %v3279_v13 = vld [vmem:[%s3793_s13 + $0x88] sm:$0xff]   ;;  %v3283_v18 = vld [vmem:[%s3793_s13 + $0x90] sm:$0xff]   ;;  %p3459_p4 = scmp.ne.s32.totalorder %s3915_s11, %s3458_s6  ;;  %s3560_s21 = smov [#allocation11]  }
 0x230   : > { %3081 = vmatpush3.bf16.msra.mxu1 %v3275_v8  ;;  %3060 = vmatprep.subr.bf16.mxu0 %v3276_v9  ;;  %v3284_v19 = vld [vmem:[%s3793_s13 + $0x58] sm:$0xff]   ;;  %v3288_v53 = vld [vmem:[%s3793_s13 + $0x60] sm:$0xff]   ;;  %v3292_v26 = vld [vmem:[%s3793_s13 + $0x68] sm:$0xff]   ;;  %s3462_s10 = sshll.u32 %s3560_s21, 4  ;;  %s3463_s10 = int_to_ptr.vmem [resolvable:$false] %s3462_s10 }
 0x231   : > { %3082 = vmatprep.subr.bf16.mxu1 %v3277_v10  ;;  %v3285_v20 = vld [vmem:[%s3793_s13 + $0xd8] sm:$0xff]   ;;  %v3289_v23 = vld [vmem:[%s3793_s13 + $0xe0] sm:$0xff]   ;;  %v3293_v27 = vld [vmem:[%s3793_s13 + $0xe8] sm:$0xff]   ;;  %p3460_p1 = pnand %p3459_p4, %p3995_p13  ;;  %p3465_p5 = scmp.lt.s32.totalorder %s3915_s11, %s3463_s10 }
 0x232   : > { %v3286_v21 = vld [vmem:[%s3793_s13 + $0x18] sm:$0xff]   ;;  %v3290_v24 = vld [vmem:[%s3793_s13 + $0x20] sm:$0xff]   ;;  %v3294_v29 = vld [vmem:[%s3793_s13 + $0x28] sm:$0xff]  }
 0x233   : > { %3061 = vmatpush3.bf16.msra.mxu0 %v3278_v11  ;;  %v3287_v22 = vld [vmem:[%s3793_s13 + $0x98] sm:$0xff]   ;;  %v3291_v25 = vld [vmem:[%s3793_s13 + $0xa0] sm:$0xff]   ;;  %v3295_v30 = vld [vmem:[%s3793_s13 + $0xa8] sm:$0xff]   ;;  %p3461_p9 = pneg %p3460_p1 }
 0x234   : > { %3083 = vmatpush3.bf16.msra.mxu1 %v3279_v13  ;;  %3062 = vmatprep.subr.bf16.mxu0 %v3280_v14  ;;  %v3296_v31 = vld [vmem:[%s3793_s13 + $0x70] sm:$0xff]   ;;  %v3300_v16 = vld [vmem:[%s3793_s13 + $0x78] sm:$0xff]   ;;  %v3308_v43 = vld [vmem:[%s3793_s13 + $0x140] sm:$0xff]  }
 0x235   : > { %3084 = vmatprep.subr.bf16.mxu1 %v3281_v15  ;;  %v3297_v32 = vld [vmem:[%s3793_s13 + $0xf0] sm:$0xff]   ;;  %v3301_v35 = vld [vmem:[%s3793_s13 + $0xf8] sm:$0xff]   ;;  %v3309_v44 = vld [vmem:[%s3793_s13 + $0x1c0] sm:$0xff]  }
 0x236   : > { %v3298_v33 = vld [vmem:[%s3793_s13 + $0x30] sm:$0xff]   ;;  %v3302_v36 = vld [vmem:[%s3793_s13 + $0x38] sm:$0xff]   ;;  %v3310_v45 = vld [vmem:[%s3793_s13 + $0x100] sm:$0xff]  }
 0x237   : > { %3063 = vmatpush3.bf16.msra.mxu0 %v3282_v17  ;;  %v3299_v34 = vld [vmem:[%s3793_s13 + $0xb0] sm:$0xff]   ;;  %v3303_v37 = vld [vmem:[%s3793_s13 + $0xb8] sm:$0xff]   ;;  %v3311_v57 = vld [vmem:[%s3793_s13 + $0x180] sm:$0xff]  }
 0x238   : > { %3085 = vmatpush3.bf16.msra.mxu1 %v3283_v18  ;;  %3064 = vmatprep.subr.bf16.mxu0 %v3284_v19  ;;  %v1908_v38 = vld [vmem:[#allocation2] sm:$0xff]  ;;  %v1909_v39 = vld [vmem:[#allocation2 + $0x8] sm:$0xff]  ;;  %v3324_v59 = vld [vmem:[%s3793_s13 + $0x160] sm:$0xff]  }
 0x239   : > { %3086 = vmatprep.subr.bf16.mxu1 %v3285_v20  ;;  %v2978_v40 = vcombine.low %v1908_v38, %v1908_v38  ;;  %v2979_v41 = vcombine.high %v1908_v38, %v1908_v38  ;;  %v2980_v12 = vcombine.low %v1909_v39, %v1909_v39  ;;  %v2981_v42 = vcombine.high %v1909_v39, %v1909_v39  ;;  %v3312_v46 = vld [vmem:[%s3793_s13 + $0x148] sm:$0xff]   ;;  %v3316_v28 = vld [vmem:[%s3793_s13 + $0x150] sm:$0xff]   ;;  %v3320_v54 = vld [vmem:[%s3793_s13 + $0x158] sm:$0xff]  }
 0x23a   : > { %v3313_v47 = vld [vmem:[%s3793_s13 + $0x1c8] sm:$0xff]   ;;  %v3317_v50 = vld [vmem:[%s3793_s13 + $0x1d0] sm:$0xff]   ;;  %v3321_v55 = vld [vmem:[%s3793_s13 + $0x1d8] sm:$0xff]  }
 0x23b   : > { %3065 = vmatpush3.bf16.msra.mxu0 %v3286_v21  ;;  %2491 = vmatprep.mubr.bf16.mxu0 %v2979_v41  ;;  %v3314_v48 = vld [vmem:[%s3793_s13 + $0x108] sm:$0xff]   ;;  %v3318_v51 = vld [vmem:[%s3793_s13 + $0x110] sm:$0xff]   ;;  %v3322_v56 = vld [vmem:[%s3793_s13 + $0x118] sm:$0xff]  }
 0x23c   : > { %3087 = vmatpush3.bf16.msra.mxu1 %v3287_v22  ;;  %3066 = vmatprep.subr.bf16.mxu0 %v3288_v53  ;;  %v3315_v49 = vld [vmem:[%s3793_s13 + $0x188] sm:$0xff]   ;;  %v3319_v52 = vld [vmem:[%s3793_s13 + $0x190] sm:$0xff]   ;;  %v3323_v58 = vld [vmem:[%s3793_s13 + $0x198] sm:$0xff]  }
 0x23d   : > { %3088 = vmatprep.subr.bf16.mxu1 %v3289_v23  ;;  %2531 = vmatprep.mubr.bf16.mxu1 %v2981_v42  ;;  %v3325_v60 = vld [vmem:[%s3793_s13 + $0x1e0] sm:$0xff]   ;;  %v3328_v63 = vld [vmem:[%s3793_s13 + $0x168] sm:$0xff]   ;;  %v3332_v3 = vld [vmem:[%s3793_s13 + $0x170] sm:$0xff]  }
 0x23e   : > { %v3326_v61 = vld [vmem:[%s3793_s13 + $0x120] sm:$0xff]   ;;  %v3329_v0 = vld [vmem:[%s3793_s13 + $0x1e8] sm:$0xff]   ;;  %v3333_v4 = vld [vmem:[%s3793_s13 + $0x1f0] sm:$0xff]  }
 0x23f   : > { %3067 = vmatpush3.bf16.msra.mxu0 %v3290_v24  ;;  %v3327_v62 = vld [vmem:[%s3793_s13 + $0x1a0] sm:$0xff]   ;;  %v3330_v1 = vld [vmem:[%s3793_s13 + $0x128] sm:$0xff]   ;;  %v3334_v5 = vld [vmem:[%s3793_s13 + $0x130] sm:$0xff]  }
 0x240   : > { %3089 = vmatpush3.bf16.msra.mxu1 %v3291_v25  ;;  %3068 = vmatprep.subr.bf16.mxu0 %v3292_v26  ;;  %v3331_v2 = vld [vmem:[%s3793_s13 + $0x1a8] sm:$0xff]   ;;  %v3335_v6 = vld [vmem:[%s3793_s13 + $0x1b0] sm:$0xff]   ;;  %v3336_v7 = vld [vmem:[%s3793_s13 + $0x178] sm:$0xff]  }
 0x241   : > { %3090 = vmatprep.subr.bf16.mxu1 %v3293_v27  ;;  %v3337_v8 = vld [vmem:[%s3793_s13 + $0x1f8] sm:$0xff]   ;;  %v1911_v15 = vld [vmem:[#allocation2 + $0x18] sm:$0xff]  ;;  %v2977_v21 = vld [vmem:[%s317_s18] ss:$0 sm:$0xff] }
 0x242   : > { %v3338_v9 = vld [vmem:[%s3793_s13 + $0x138] sm:$0xff]   ;;  %v2984_v17 = vcombine.low %v1911_v15, %v1911_v15  ;;  %v2985_v18 = vcombine.high %v1911_v15, %v1911_v15 }
 0x243   : > { %3069 = vmatpush3.bf16.msra.mxu0 %v3294_v29  ;;  %v3339_v10 = vld [vmem:[%s3793_s13 + $0x1b8] sm:$0xff]   ;;  %s3464_s13 = scalar_lea.vmem %s3463_s10, 256 }
 0x244   : > { %3091 = vmatpush3.bf16.msra.mxu1 %v3295_v30  ;;  %3070 = vmatprep.subr.bf16.mxu0 %v3296_v31  ;;  %v1910_v11 = vld [vmem:[#allocation2 + $0x10] sm:$0xff]  ;;  %p3466_p3 = scmp.lt.s32.totalorder %s3464_s13, %s3458_s6 }
 0x245   : > { %3092 = vmatprep.subr.bf16.mxu1 %v3297_v32  ;;  %v2982_v13 = vcombine.low %v1910_v11, %v1910_v11  ;;  %v2983_v14 = vcombine.high %v1910_v11, %v1910_v11 }
 0x246   : > { %p3467_p10 = por %p3466_p3, %p3465_p5 }
 0x247   : > { %3071 = vmatpush3.bf16.msra.mxu0 %v3298_v33 }
 0x248   : > { %3093 = vmatpush3.bf16.msra.mxu1 %v3299_v34  ;;  %3072 = vmatprep.subr.bf16.mxu0 %v3300_v16  ;;  %p3468_p0 = pnand %p3467_p10, %p3461_p9 }
 0x249   : > { %3094 = vmatprep.subr.bf16.mxu1 %v3301_v35 }
 0x24b   : > { %3073 = vmatpush3.bf16.msra.mxu0 %v3302_v36 }
 0x24c   : > { %3095 = vmatpush3.bf16.msra.mxu1 %v3303_v37  ;;  %3102 = vmatprep.subr.bf16.mxu0 %v3308_v43 }
 0x24d   : > { %3124 = vmatprep.subr.bf16.mxu1 %v3309_v44 }
 0x24e   : > { %2492 = vmatmul.mubr.bf16.vlgmr.msra.gmra.mrb[0].mxu0 %v2978_v40 }
 0x24f   : > { %2532 = vmatmul.mubr.bf16.vlgmr.msra.gmra.mrb[0].mxu1 %v2980_v12  ;;  %3103 = vmatpush3.bf16.msra.mxu0 %v3310_v45 }
 0x250   : > { %3125 = vmatpush3.bf16.msra.mxu1 %v3311_v57  ;;  %3104 = vmatprep.subr.bf16.mxu0 %v3312_v46 }
 0x251   : > { %3126 = vmatprep.subr.bf16.mxu1 %v3313_v47  ;;  %2571 = vmatprep.mubr.bf16.mxu0 %v2983_v14 }
 0x252   : > { %2611 = vmatprep.mubr.bf16.mxu1 %v2985_v18 }
 0x253   : > { %3105 = vmatpush3.bf16.msra.mxu0 %v3314_v48 }
 0x254   : > { %3127 = vmatpush3.bf16.msra.mxu1 %v3315_v49  ;;  %3106 = vmatprep.subr.bf16.mxu0 %v3316_v28 }
 0x255   : > { %3128 = vmatprep.subr.bf16.mxu1 %v3317_v50 }
 0x257   : > { %3107 = vmatpush3.bf16.msra.mxu0 %v3318_v51 }
 0x258   : > { %3129 = vmatpush3.bf16.msra.mxu1 %v3319_v52  ;;  %3108 = vmatprep.subr.bf16.mxu0 %v3320_v54 }
 0x259   : > { %3130 = vmatprep.subr.bf16.mxu1 %v3321_v55 }
 0x25b   : > { %3109 = vmatpush3.bf16.msra.mxu0 %v3322_v56 }
 0x25c   : > { %3131 = vmatpush3.bf16.msra.mxu1 %v3323_v58  ;;  %3110 = vmatprep.subr.bf16.mxu0 %v3324_v59 }
 0x25d   : > { %3132 = vmatprep.subr.bf16.mxu1 %v3325_v60 }
 0x25f   : > { %3111 = vmatpush3.bf16.msra.mxu0 %v3326_v61 }
 0x260   : > { %3133 = vmatpush3.bf16.msra.mxu1 %v3327_v62  ;;  %3112 = vmatprep.subr.bf16.mxu0 %v3328_v63 }
 0x261   : > { %3134 = vmatprep.subr.bf16.mxu1 %v3329_v0 }
 0x263   : > { %3113 = vmatpush3.bf16.msra.mxu0 %v3330_v1 }
 0x264   : > { %3135 = vmatpush3.bf16.msra.mxu1 %v3331_v2  ;;  %3114 = vmatprep.subr.bf16.mxu0 %v3332_v3 }
 0x265   : > { %3136 = vmatprep.subr.bf16.mxu1 %v3333_v4 }
 0x267   : > { %3115 = vmatpush3.bf16.msra.mxu0 %v3334_v5 }
 0x268   : > { %3137 = vmatpush3.bf16.msra.mxu1 %v3335_v6  ;;  %3116 = vmatprep.subr.bf16.mxu0 %v3336_v7 }
 0x269   : > { %3138 = vmatprep.subr.bf16.mxu1 %v3337_v8 }
 0x26b   : > { %3117 = vmatpush3.bf16.msra.mxu0 %v3338_v9 }
 0x26c   : > { %3139 = vmatpush3.bf16.msra.mxu1 %v3339_v10 }
 0x26e   : > { %2572 = vmatmul.mubr.bf16.vlgmr.msra.gmra.mrb[4].mxu0 %v2982_v13 }
 0x26f   : > { %2612 = vmatmul.mubr.bf16.vlgmr.msra.gmra.mrb[4].mxu1 %v2984_v17 }
 0x321   : > { %v3074_v19 = vpop.f32.mrb[0].mxu0 }
 0x322   : > { %v3096_v20 = vpop.f32.mrb[0].mxu1  ;;  %v3075_v22 = vpop.f32.mrb[1].mxu0 }
 0x323   : > { %v3097_v53 = vpop.f32.mrb[1].mxu1  ;;  %v3076_v23 = vadd.f32 %v3075_v22, %v3074_v19  ;;  %v3077_v25 = vpop.f32.mrb[2].mxu0 }
 0x324   : > { %v3098_v24 = vadd.f32 %v3097_v53, %v3096_v20  ;;  %v3099_v26 = vpop.f32.mrb[2].mxu1  ;;  %v3078_v27 = vpop.f32.mrb[3].mxu0 }
 0x325   : > { %v3100_v29 = vpop.f32.mrb[3].mxu1  ;;  %v2494_v30 = vadd.f32 %v3076_v23, %v2977_v21 }
 0x327   : > { %v2534_v31 = vadd.f32 %v3098_v24, %v2494_v30 }
 0x341   : > { %v3118_v32 = vpop.f32.mrb[4].mxu0 }
 0x342   : > { %v3140_v33 = vpop.f32.mrb[4].mxu1  ;;  %v3119_v34 = vpop.f32.mrb[5].mxu0 }
 0x343   : > { %v3141_v16 = vpop.f32.mrb[5].mxu1  ;;  %v3120_v35 = vadd.f32 %v3119_v34, %v3118_v32  ;;  %v3121_v37 = vpop.f32.mrb[6].mxu0 }
 0x344   : > { %v3142_v36 = vadd.f32 %v3141_v16, %v3140_v33  ;;  %v3143_v38 = vpop.f32.mrb[6].mxu1  ;;  %v3122_v39 = vpop.f32.mrb[7].mxu0 }
 0x345   : > { %v3144_v40 = vpop.f32.mrb[7].mxu1  ;;  %v2574_v41 = vadd.f32 %v3120_v35, %v2534_v31 }
 0x347   : > { %v2614_v12 = vadd.f32 %v3142_v36, %v2574_v41 }
 0x349   : > { %2619 = vst [vmem:[%s3808_s7] sm:$0xff] %v2614_v12 }
 0x34a   : > { %3471 = shalt.err (!%p3468_p0)
}
 0x34b   : > { %s3472_s8 = scalar_lea.hbm %s3913_s14, 128  ;;  %s3476_s24 = scalar_lea.hbm %s3968_s5, 256 }
 0x34c   : > { %p3473_p2 = scmp.ne.s32.totalorder %s3913_s14, %s3472_s8  ;;  %p3477_p6 = scmp.lt.u32.totalorder %s3913_s14, %s3968_s5 }
 0x34d   : > { %p3478_p7 = scmp.lt.u32.totalorder %s3476_s24, %s3472_s8  ;;  %p3480_p4 = scmp.lt.u32.totalorder %s3472_s8, %s3913_s14 }
 0x34e   : > { %p3474_p8 = pnand %p3473_p2, %p3995_p13 }
 0x34f   : > { %p3479_p11 = por %p3478_p7, %p3477_p6 }
 0x350   : > { %p3475_p12 = pneg %p3474_p8 }
 0x351   : > { %p3481_p1 = por %p3480_p4, %p3479_p11 }
 0x353   : > { %p3482_p9 = pnand %p3481_p1, %p3475_p12 }
 0x355   : > { %3485 = shalt.err (!%p3482_p9)
}
 0x356   : > { %3184 = dma.vmem_to_hbm [thread:$0]  (%p3995_p13), %s3915_s11, 128, %s3913_s14, %s2621_s25  }
 0x357 PF: > { %s3996_s7 = sld [smem:[#allocation16_spill]]  ;;  %s3997_s28 = sld [smem:[#allocation18_spill]] }
 0x358   : > { %s3998_s23 = sld [smem:[#allocation17_spill]] }
 0x35d   : > { %s2648_s27 = sand.u32 1, %s3996_s7   ;;  %p3999_p5 = scmp.ne.s32.totalorder %s3997_s28, 0 }
 0x35e   : > { %p4000_p3 = scmp.ge.s32.totalorder %s3998_s23, 2  ;;  %s2649_s12 = scalar_lea.sflag [#allocation5], %s2648_s27 }
 0x360   : > { %p3201_p10 = pnand %p4000_p3, %p3999_p5 }
 0x362   : > { %3523 = dma.done.wait (!%p3201_p10), %s2649_s12, 128  }
 0x363   : > { %3525 = vsyncadd (!%p3201_p10), %s2649_s12, 4294967168  ;;  %s23_s23 = sadd.s32 1, %s3998_s23   ;;  %s4001_s18 = smov %s3532_s19 }
 0x364   : > { %p20_p0 = scmp.ge.s32.totalorder %s23_s23, 4   ;;  %s4002_s19 = smov %s3536_s20 }
 0x365   : > { %s4003_s20 = smov %s3748_s17  ;;  %s4004_s21 = smov %s3544_s22 }
 0x366   : > { %s4005_s22 = smov %s4007_s16  ;;  %22 = sbr.rel (!%p20_p0) target bundleno = 8 (0x8), region = 108 }
 0x36d   :  { %2654 = vsyncpa [#allocation4], 1 }
 0x36e   :  { %2656 = vsyncpa [#allocation4 + $0x1], 1 }
 0x36f   :  { %2657 = vsyncpa [#allocation7], 1 }
 0x370   :  { %2658 = vsyncpa [#allocation10], 1 }
 0x371   :  { %2660 = vsyncpa [#allocation10 + $0x1], 1 }
 0x372   :  { %2661 = vsyncpa [#allocation5], 1 }
 0x373   :  { %2663 = vsyncpa [#allocation5 + $0x1], 1 }

</bundles_post_ra>
